<compile_context>
chip_gen: v5e
topology: v5e:2x2
jax: 0.10.0
libtpu: 0.0.40
codegen_flags: <defaults>
</compile_context>

<pallas_src>
import numpy as np
from math import exp

import jax
import jax.numpy as jnp
from jax import lax
from jax.experimental import pallas as pl
from jax.experimental.pallas import tpu as pltpu


WINDOW_SIZE = 11
SIGMA = 1.5
C1 = 0.01 ** 2
C2 = 0.03 ** 2


def _gauss_1d(window_size, sigma):
    g = np.array(
        [exp(-(x - window_size // 2) ** 2 / float(2 * sigma ** 2))
         for x in range(window_size)], dtype=np.float64)
    g = g / g.sum()
    return g.astype(np.float32)


def _band(n, g1d):
    """Banded (n, n) matrix == 1-D 'same' convolution with zero padding."""
    K = g1d.shape[0]
    pad = K // 2
    idx = np.arange(n)
    d = idx[:, None] - idx[None, :] + pad          # tap index per (i, j)
    M = np.where((d >= 0) & (d < K), g1d[np.clip(d, 0, K - 1)], 0.0)
    return M.astype(np.float32)


def _block_band(w, tn, g1d):
    """Block-diagonal (tn*w, tn*w): one banded W-blur per image packed on lanes."""
    bw = _band(w, g1d)
    out = np.zeros((tn * w, tn * w), np.float32)
    for t in range(tn):
        out[t * w:(t + 1) * w, t * w:(t + 1) * w] = bw
    return out


def _ssim_kernel(x1_ref, x2_ref, bh_ref, bw_ref, o_ref):
    """One block of TN images, laid out (H, L = TN*W) in VMEM."""
    x1 = x1_ref[...]            # (H, L) float32
    x2 = x2_ref[...]
    bh = bh_ref[...]            # (H, H) banded Gaussian (vertical blur)
    bw = bw_ref[...]            # (L, L) block-diag banded Gaussian (horizontal blur)

    def blur(s):
        v = jnp.dot(bh, s, preferred_element_type=jnp.float32,
                    precision=lax.Precision.HIGHEST)
        return jnp.dot(v, bw, preferred_element_type=jnp.float32,
                       precision=lax.Precision.HIGHEST)

    mu1 = blur(x1)
    mu2 = blur(x2)
    e11 = blur(x1 * x1)
    e22 = blur(x2 * x2)
    e12 = blur(x1 * x2)

    mu1_sq = mu1 * mu1
    mu2_sq = mu2 * mu2
    mu1_mu2 = mu1 * mu2
    sigma1_sq = e11 - mu1_sq
    sigma2_sq = e22 - mu2_sq
    sigma12 = e12 - mu1_mu2

    ssim_map = ((2.0 * mu1_mu2 + C1) * (2.0 * sigma12 + C2)) / (
        (mu1_sq + mu2_sq + C1) * (sigma1_sq + sigma2_sq + C2))

    # Partial reduction only: sum over the sublane (H) axis, keep the
    # lane-dense (1, L) vector.  Final cross-lane/cross-block reduce is
    # done outside the kernel.
    o_ref[0] = jnp.sum(ssim_map, axis=0, keepdims=True)


def _pick_tn(N, H, W, budget_bytes=20 * 1024 * 1024):
    """Largest divisor of N whose block comfortably fits scoped VMEM."""
    def est(tn):
        L = tn * W
        # 2 double-buffered inputs + gaussian matrices + ~12 live intermediates + out.
        return 4 * (4 * H * L + 2 * L * L + 2 * H * H + 12 * H * L + 2 * L)

    cands = [tn for tn in range(1, N + 1) if N % tn == 0 and est(tn) <= budget_bytes]
    # Prefer blocks whose lane extent is the full array or a multiple of 128.
    pref = [tn for tn in cands if tn == N or (tn * W) % 128 == 0]
    pool = pref or cands or [1]
    return max(pool)


def ssim_pallas(img1, img2, window_size=WINDOW_SIZE, size_average=True):
    # TODO(synk): only the module-default size_average=True path is implemented.
    assert size_average, "only size_average=True (module default) is implemented"
    assert img1.shape == img2.shape
    B, C, H, W = img1.shape
    N = B * C
    g = _gauss_1d(window_size, SIGMA)

    TN = _pick_tn(N, H, W)
    L = TN * W
    nb = N // TN

    bh = jnp.asarray(_band(H, g))              # (H, H)
    bw = jnp.asarray(_block_band(W, TN, g))    # (L, L)

    def prep(x):
        # Layout plumbing only: (B,C,H,W) -> (H, N*W) so the lane axis is dense
        # and both Gaussian passes are plain 2-D matmuls (no padding, no
        # in-kernel relayout).
        x = x.astype(jnp.float32).reshape(N, H, W)
        return jnp.transpose(x, (1, 0, 2)).reshape(H, N * W)

    x1 = prep(img1)
    x2 = prep(img2)

    out = pl.pallas_call(
        _ssim_kernel,
        out_shape=jax.ShapeDtypeStruct((nb, 1, L), jnp.float32),
        grid=(nb,),
        in_specs=[
            pl.BlockSpec((H, L), lambda i: (0, i)),
            pl.BlockSpec((H, L), lambda i: (0, i)),
            pl.BlockSpec((H, H), lambda i: (0, 0)),
            pl.BlockSpec((L, L), lambda i: (0, 0)),
        ],
        out_specs=pl.BlockSpec((1, 1, L), lambda i: (i, 0, 0)),
        compiler_params=pltpu.CompilerParams(
            dimension_semantics=("parallel",),
            vmem_limit_bytes=48 * 1024 * 1024,
        ),
    )(x1, x2, bh, bw)

    return jnp.sum(out) / float(N * H * W)


def ssim_reference(img1, img2, window_size=WINDOW_SIZE):
    """Pure-JAX reference mirroring the PyTorch _ssim (depthwise 2-D conv)."""
    B, C, H, W = img1.shape
    pad = window_size // 2
    g = _gauss_1d(window_size, SIGMA)
    w2d = np.outer(g, g).astype(np.float32)
    window = jnp.asarray(np.ascontiguousarray(
        np.broadcast_to(w2d, (C, 1, window_size, window_size))))

    def conv(x):
        return lax.conv_general_dilated(
            x.astype(jnp.float32), window, window_strides=(1, 1),
            padding=[(pad, pad), (pad, pad)],
            dimension_numbers=("NCHW", "OIHW", "NCHW"),
            feature_group_count=C, precision=lax.Precision.HIGHEST)

    mu1, mu2 = conv(img1), conv(img2)
    mu1_sq, mu2_sq, mu1_mu2 = mu1 * mu1, mu2 * mu2, mu1 * mu2
    sigma1_sq = conv(img1 * img1) - mu1_sq
    sigma2_sq = conv(img2 * img2) - mu2_sq
    sigma12 = conv(img1 * img2) - mu1_mu2
    ssim_map = ((2 * mu1_mu2 + C1) * (2 * sigma12 + C2)) / (
        (mu1_sq + mu2_sq + C1) * (sigma1_sq + sigma2_sq + C2))
    return jnp.mean(ssim_map)


if __name__ == "__main__":
    key = jax.random.PRNGKey(0)
    k1, k2 = jax.random.split(key)
    B, C, H, W = 2, 4, 16, 16
    img1 = jax.random.uniform(k1, (B, C, H, W), dtype=jnp.float32)
    # img2 = slightly perturbed img1 so SSIM is non-trivial
    img2 = jnp.clip(img1 + 0.1 * jax.random.normal(k2, (B, C, H, W), dtype=jnp.float32), 0.0, 1.0)

    out = jax.block_until_ready(ssim_pallas(img1, img2))
    ref = jax.block_until_ready(ssim_reference(img1, img2))
    np.testing.assert_allclose(np.asarray(out), np.asarray(ref), rtol=1e-3, atol=1e-3)

    print("KERNEL_OK")
</pallas_src>

<mosaic_0001>
module attributes {stable_mosaic.version = 11 : i64} {
  func.func @_ssim_kernel(%arg0: i32, %arg1: memref<16x128xf32, #tpu.memory_space<vmem>>, %arg2: memref<16x128xf32, #tpu.memory_space<vmem>>, %arg3: memref<16x16xf32, #tpu.memory_space<vmem>>, %arg4: memref<128x128xf32, #tpu.memory_space<vmem>>, %arg5: memref<1x1x128xf32, #tpu.memory_space<vmem>>) attributes {dimension_semantics = [#tpu.dimension_semantics<parallel>], iteration_bounds = array<i64: 1>, scalar_prefetch = 0 : i64, scratch_operands = 0 : i64, tpu.core_type = #tpu.core_type<tc>, window_params = [{transform_indices = @transform_0, window_bounds = array<i64: 16, 128>}, {transform_indices = @transform_1, window_bounds = array<i64: 16, 128>}, {pipeline_mode = #tpu.pipeline_mode<synchronous>, transform_indices = @transform_2, window_bounds = array<i64: 16, 16>}, {pipeline_mode = #tpu.pipeline_mode<synchronous>, transform_indices = @transform_3, window_bounds = array<i64: 128, 128>}, {transform_indices = @transform_4, window_bounds = array<i64: 1, 1, 128>}]} {
    %c0 = arith.constant 0 : index
    %c0_0 = arith.constant 0 : index
    %0 = vector.load %arg1[%c0, %c0_0] : memref<16x128xf32, #tpu.memory_space<vmem>>, vector<16x128xf32>
    %c0_1 = arith.constant 0 : index
    %c0_2 = arith.constant 0 : index
    %1 = vector.load %arg2[%c0_1, %c0_2] : memref<16x128xf32, #tpu.memory_space<vmem>>, vector<16x128xf32>
    %c0_3 = arith.constant 0 : index
    %c0_4 = arith.constant 0 : index
    %2 = vector.load %arg3[%c0_3, %c0_4] : memref<16x16xf32, #tpu.memory_space<vmem>>, vector<16x16xf32>
    %c0_5 = arith.constant 0 : index
    %c0_6 = arith.constant 0 : index
    %3 = vector.load %arg4[%c0_5, %c0_6] : memref<128x128xf32, #tpu.memory_space<vmem>>, vector<128x128xf32>
    %cst = arith.constant dense<0.000000e+00> : vector<16x128xf32>
    %4 = tpu.matmul %2, %0, %cst {dimension_numbers = #tpu.dot_dimension_numbers<[1], [0], [0], [1], [0, 0, 1, 1], [], []>, precision = #tpu.contract_precision<fp32>} : vector<16x16xf32>, vector<16x128xf32>, vector<16x128xf32> -> vector<16x128xf32>
    %cst_7 = arith.constant dense<0.000000e+00> : vector<16x128xf32>
    %5 = tpu.matmul %4, %3, %cst_7 {dimension_numbers = #tpu.dot_dimension_numbers<[1], [0], [0], [1], [0, 0, 1, 1], [], []>, precision = #tpu.contract_precision<fp32>} : vector<16x128xf32>, vector<128x128xf32>, vector<16x128xf32> -> vector<16x128xf32>
    %cst_8 = arith.constant dense<0.000000e+00> : vector<16x128xf32>
    %6 = tpu.matmul %2, %1, %cst_8 {dimension_numbers = #tpu.dot_dimension_numbers<[1], [0], [0], [1], [0, 0, 1, 1], [], []>, precision = #tpu.contract_precision<fp32>} : vector<16x16xf32>, vector<16x128xf32>, vector<16x128xf32> -> vector<16x128xf32>
    %cst_9 = arith.constant dense<0.000000e+00> : vector<16x128xf32>
    %7 = tpu.matmul %6, %3, %cst_9 {dimension_numbers = #tpu.dot_dimension_numbers<[1], [0], [0], [1], [0, 0, 1, 1], [], []>, precision = #tpu.contract_precision<fp32>} : vector<16x128xf32>, vector<128x128xf32>, vector<16x128xf32> -> vector<16x128xf32>
    %8 = arith.mulf %0, %0 : vector<16x128xf32>
    %cst_10 = arith.constant dense<0.000000e+00> : vector<16x128xf32>
    %9 = tpu.matmul %2, %8, %cst_10 {dimension_numbers = #tpu.dot_dimension_numbers<[1], [0], [0], [1], [0, 0, 1, 1], [], []>, precision = #tpu.contract_precision<fp32>} : vector<16x16xf32>, vector<16x128xf32>, vector<16x128xf32> -> vector<16x128xf32>
    %cst_11 = arith.constant dense<0.000000e+00> : vector<16x128xf32>
    %10 = tpu.matmul %9, %3, %cst_11 {dimension_numbers = #tpu.dot_dimension_numbers<[1], [0], [0], [1], [0, 0, 1, 1], [], []>, precision = #tpu.contract_precision<fp32>} : vector<16x128xf32>, vector<128x128xf32>, vector<16x128xf32> -> vector<16x128xf32>
    %11 = arith.mulf %1, %1 : vector<16x128xf32>
    %cst_12 = arith.constant dense<0.000000e+00> : vector<16x128xf32>
    %12 = tpu.matmul %2, %11, %cst_12 {dimension_numbers = #tpu.dot_dimension_numbers<[1], [0], [0], [1], [0, 0, 1, 1], [], []>, precision = #tpu.contract_precision<fp32>} : vector<16x16xf32>, vector<16x128xf32>, vector<16x128xf32> -> vector<16x128xf32>
    %cst_13 = arith.constant dense<0.000000e+00> : vector<16x128xf32>
    %13 = tpu.matmul %12, %3, %cst_13 {dimension_numbers = #tpu.dot_dimension_numbers<[1], [0], [0], [1], [0, 0, 1, 1], [], []>, precision = #tpu.contract_precision<fp32>} : vector<16x128xf32>, vector<128x128xf32>, vector<16x128xf32> -> vector<16x128xf32>
    %14 = arith.mulf %0, %1 : vector<16x128xf32>
    %cst_14 = arith.constant dense<0.000000e+00> : vector<16x128xf32>
    %15 = tpu.matmul %2, %14, %cst_14 {dimension_numbers = #tpu.dot_dimension_numbers<[1], [0], [0], [1], [0, 0, 1, 1], [], []>, precision = #tpu.contract_precision<fp32>} : vector<16x16xf32>, vector<16x128xf32>, vector<16x128xf32> -> vector<16x128xf32>
    %cst_15 = arith.constant dense<0.000000e+00> : vector<16x128xf32>
    %16 = tpu.matmul %15, %3, %cst_15 {dimension_numbers = #tpu.dot_dimension_numbers<[1], [0], [0], [1], [0, 0, 1, 1], [], []>, precision = #tpu.contract_precision<fp32>} : vector<16x128xf32>, vector<128x128xf32>, vector<16x128xf32> -> vector<16x128xf32>
    %17 = arith.mulf %5, %5 : vector<16x128xf32>
    %18 = arith.mulf %7, %7 : vector<16x128xf32>
    %19 = arith.mulf %5, %7 : vector<16x128xf32>
    %20 = arith.subf %10, %17 : vector<16x128xf32>
    %21 = arith.subf %13, %18 : vector<16x128xf32>
    %22 = arith.subf %16, %19 : vector<16x128xf32>
    %cst_16 = arith.constant 2.000000e+00 : f32
    %23 = vector.broadcast %cst_16 : f32 to vector<16x128xf32>
    %24 = arith.mulf %23, %19 : vector<16x128xf32>
    %cst_17 = arith.constant 9.99999974E-5 : f32
    %25 = vector.broadcast %cst_17 : f32 to vector<16x128xf32>
    %26 = arith.addf %24, %25 : vector<16x128xf32>
    %cst_18 = arith.constant 2.000000e+00 : f32
    %27 = vector.broadcast %cst_18 : f32 to vector<16x128xf32>
    %28 = arith.mulf %27, %22 : vector<16x128xf32>
    %cst_19 = arith.constant 8.99999984E-4 : f32
    %29 = vector.broadcast %cst_19 : f32 to vector<16x128xf32>
    %30 = arith.addf %28, %29 : vector<16x128xf32>
    %31 = arith.mulf %26, %30 : vector<16x128xf32>
    %32 = arith.addf %17, %18 : vector<16x128xf32>
    %cst_20 = arith.constant 9.99999974E-5 : f32
    %33 = vector.broadcast %cst_20 : f32 to vector<16x128xf32>
    %34 = arith.addf %32, %33 : vector<16x128xf32>
    %35 = arith.addf %20, %21 : vector<16x128xf32>
    %cst_21 = arith.constant 8.99999984E-4 : f32
    %36 = vector.broadcast %cst_21 : f32 to vector<16x128xf32>
    %37 = arith.addf %35, %36 : vector<16x128xf32>
    %38 = arith.mulf %34, %37 : vector<16x128xf32>
    %39 = arith.divf %31, %38 : vector<16x128xf32>
    %cst_22 = arith.constant dense<0.000000e+00> : vector<128xf32>
    %40 = vector.multi_reduction <add>, %39, %cst_22 [0] : vector<16x128xf32> to vector<128xf32>
    %41 = vector.shape_cast %40 : vector<128xf32> to vector<1x128xf32>
    %c0_23 = arith.constant 0 : index
    %c0_24 = arith.constant 0 : index
    %c0_25 = arith.constant 0 : index
    %42 = vector.load %arg5[%c0_23, %c0_24, %c0_25] : memref<1x1x128xf32, #tpu.memory_space<vmem>>, vector<1x1x128xf32>
    %43 = vector.shape_cast %42 : vector<1x1x128xf32> to vector<1x128xf32>
    %44 = vector.shape_cast %41 : vector<1x128xf32> to vector<1x1x128xf32>
    tpu.vector_store %arg5[%c0_23, %c0_24, %c0_25], %44 {strides = array<i32>} : memref<1x1x128xf32, #tpu.memory_space<vmem>>, vector<1x1x128xf32>,
    return
  }
  func.func @transform_0(%arg0: i32) -> (i32, i32) {
    %c0_i32 = arith.constant 0 : i32
    %c0_i32_0 = arith.constant 0 : i32
    return %c0_i32, %arg0 : i32, i32
  }
  func.func @transform_1(%arg0: i32) -> (i32, i32) {
    %c0_i32 = arith.constant 0 : i32
    %c0_i32_0 = arith.constant 0 : i32
    return %c0_i32, %arg0 : i32, i32
  }
  func.func @transform_2(%arg0: i32) -> (i32, i32) {
    %c0_i32 = arith.constant 0 : i32
    %c0_i32_0 = arith.constant 0 : i32
    %c0_i32_1 = arith.constant 0 : i32
    return %c0_i32, %c0_i32_0 : i32, i32
  }
  func.func @transform_3(%arg0: i32) -> (i32, i32) {
    %c0_i32 = arith.constant 0 : i32
    %c0_i32_0 = arith.constant 0 : i32
    %c0_i32_1 = arith.constant 0 : i32
    return %c0_i32, %c0_i32_0 : i32, i32
  }
  func.func @transform_4(%arg0: i32) -> (i32, i32, i32) {
    %c0_i32 = arith.constant 0 : i32
    %c0_i32_0 = arith.constant 0 : i32
    %c0_i32_1 = arith.constant 0 : i32
    return %arg0, %c0_i32, %c0_i32_0 : i32, i32, i32
  }
}

</mosaic_0001>

<bundles_post_ra>
// kernel: tpu_custom_call.1
= control target key start
LH: loop header
LB: loop body
LE: loop exit
PB: predicated region body
PF: predicated region fallthrough
CT: control target
= control target key end

     0   :  { %9 = vsyncpa [#allocation3], 0  ;;  %s4104_s0 = inlined_call_operand.hbm [shape: f32[16,128], index: 0, kind: input, shape index: {}]   ;;  %s4105_s1 = inlined_call_operand.hbm [shape: f32[16,128], index: 1, kind: input, shape index: {}]   ;;  %s4106_s2 = inlined_call_operand.hbm [shape: f32[16,16], index: 2, kind: input, shape index: {}]   ;;  %s4107_s3 = inlined_call_operand.hbm [shape: f32[128,128], index: 3, kind: input, shape index: {}]   ;;  %s4108_s4 = inlined_call_operand.hbm [shape: f32[1,1,128], index: 4, kind: output, shape index: {}]  }
   0x1   :  { %10 = vsyncpa [#allocation6], 0 }
   0x2   :  { %11 = vsyncpa [#allocation9], 0 }
   0x3   :  { %12 = vsyncpa [#allocation4], 0  ;;  %s30_s17 = sshll.u32 %s4105_s1, 4  ;;  %s3162_s18 = smov [#allocation5]   ;;  %s31_s17 = int_to_ptr.hbm [resolvable:$true] %s30_s17 }
   0x4   :  { %s32_s19 = sshll.u32 %s3162_s18, 4  ;;  %s17_s22 = sshll.u32 %s4104_s0, 4  ;;  %s33_s19 = int_to_ptr.vmem [resolvable:$true] %s32_s19  ;;  %s18_s22 = int_to_ptr.hbm [resolvable:$true] %s17_s22 }
   0x5   :  { %s3163_s23 = smov 128   ;;  %s3164_s24 = smov 8  }
   0x6   :  { %38 = dma.hbm_to_vmem [thread:$0]  %s31_s17, 256, %s33_s19, [#allocation6], %s3163_s23, %s3163_s23, %s3164_s24  }
   0x7   :  { %s3165_s25 = smov [#allocation2]   ;;  %s43_s29 = sshll.u32 %s4106_s2, 4  ;;  %s44_s29 = int_to_ptr.hbm [resolvable:$true] %s43_s29 }
   0x8   :  { %s19_s26 = sshll.u32 %s3165_s25, 4  ;;  %s56_s5 = sshll.u32 %s4107_s3, 4  ;;  %s20_s26 = int_to_ptr.vmem [resolvable:$true] %s19_s26  ;;  %s57_s5 = int_to_ptr.hbm [resolvable:$true] %s56_s5 }
   0x9   :  { %25 = dma.hbm_to_vmem [thread:$0]  %s18_s22, 256, %s20_s26, [#allocation3], %s3163_s23, %s3163_s23, %s3164_s24  }
   0xa   :  { %s3166_s6 = smov [#allocation7]   ;;  %s3167_s0 = smov [#allocation8]  }
   0xb   :  { %s45_s7 = sshll.u32 %s3166_s6, 4  ;;  %s58_s8 = sshll.u32 %s3167_s0, 4  ;;  %s46_s7 = int_to_ptr.vmem [resolvable:$true] %s45_s7  ;;  %s59_s8 = int_to_ptr.vmem [resolvable:$true] %s58_s8 }
   0xc   :  { %51 = dma.hbm_to_vmem [thread:$0]  %s44_s29, 256, %s46_s7, [#allocation6], %s3163_s23, %s3163_s23, %s3164_s24  }
   0xd   :  { %64 = dma.hbm_to_vmem [thread:$0]  %s57_s5, 2048, %s59_s8, [#allocation9], %s3163_s23, %s3163_s23, %s3164_s24  }
   0xe   :  { %3154 = dma.done.wait [#allocation3], 256  }
   0xf   :  { %3155 = vsyncadd [#allocation3], 4294967040 }
  0x10   :  { %3156 = dma.done.wait [#allocation6], 512  }
  0x11   :  { %3157 = vsyncadd [#allocation6], 4294966784 }
  0x12   :  { %3158 = dma.done.wait [#allocation9], 2048  }
  0x13   :  { %3159 = vsyncadd [#allocation9], 4294965248  ;;  %vm103_vm0 = vcmask 130048   ;;  %v3206_v0 = vld [vmem:[#allocation2 + $0x8] sm:$0xff]  ;;  %v3208_v1 = vld [vmem:[#allocation2] sm:$0xff]  ;;  %s3168_s2 = smov [#allocation10]  }
  0x14   :  { %4226 = vst [vmem:[#allocation15_spill] sm:$0xff] %v3206_v0  ;;  %v85_v2 = vld [vmem:[#allocation7] sm:$0xff]  ;;  %v3211_v3 = vand.u32 4294901760, %v3206_v0  ;;  %v3214_v4 = vand.u32 4294901760, %v3208_v1  ;;  %v86_v5 = vld [vmem:[#allocation7 + $0x8] sm:$0xff]  ;;  %v100_v18 = vld [vmem:[#allocation8 + $0x68] sm:$0xff] }
  0x15   :  { %4227 = vst [vmem:[#allocation16_spill] sm:$0xff] %v3208_v1  ;;  %v105_v6 = vsel %vm103_vm0, %v85_v2, 0  ;;  %v108_v7 = vsel %vm103_vm0, %v86_v5, 0  ;;  %v102_v16 = vld [vmem:[#allocation8 + $0x78] sm:$0xff]  ;;  %v101_v17 = vld [vmem:[#allocation8 + $0x70] sm:$0xff]  ;;  %v99_v23 = vld [vmem:[#allocation8 + $0x60] sm:$0xff] }
  0x16   :  { %v160_v8 = vsub.f32 %v3206_v0, %v3211_v3  ;;  %125 = vmatpush.msra.mxu0 %v3211_v3  ;;  %v166_v9 = vsub.f32 %v3208_v1, %v3214_v4  ;;  %226 = vmatpush.msra.mxu3 %v3211_v3  ;;  %v3222_v10 = vand.u32 4294901760, %v105_v6  ;;  %v3224_v11 = vand.u32 4294901760, %v108_v7  ;;  %v98_v28 = vld [vmem:[#allocation8 + $0x58] sm:$0xff]  ;;  %v97_v29 = vld [vmem:[#allocation8 + $0x50] sm:$0xff]  ;;  %v96_v37 = vld [vmem:[#allocation8 + $0x48] sm:$0xff]  ;;  %s3001_s3 = sshll.u32 %s3168_s2, 4  ;;  %s3002_s3 = int_to_ptr.vmem [resolvable:$true] %s3001_s3 }
  0x17   :  { %v3241_v24 = vand.u32 4294901760, %v102_v16  ;;  %v3243_v25 = vand.u32 4294901760, %v101_v17  ;;  %v3245_v26 = vand.u32 4294901760, %v100_v18  ;;  %v3247_v27 = vand.u32 4294901760, %v99_v23  ;;  %v95_v38 = vld [vmem:[#allocation8 + $0x40] sm:$0xff]  ;;  %v94_v58 = vld [vmem:[#allocation8 + $0x38] sm:$0xff] }
  0x18   :  { %196 = vmatpush.msra.mxu2 %v160_v8  ;;  %v3227_v12 = vsub.f32 %v105_v6, %v3222_v10  ;;  %127 = vmatpush.msra.mxu0 %v3214_v4  ;;  %v161_v13 = vand.u32 4294901760, %v160_v8  ;;  %v167_v14 = vand.u32 4294901760, %v166_v9  ;;  %v3231_v15 = vsub.f32 %v108_v7, %v3224_v11  ;;  %v93_v59 = vld [vmem:[#allocation8 + $0x30] sm:$0xff]  ;;  %v92_v60 = vld [vmem:[#allocation8 + $0x28] sm:$0xff]  ;;  %v91_v6 = vld [vmem:[#allocation8 + $0x20] sm:$0xff]  ;;  %s3003_s11 = sshll.u32 %s4108_s4, 4  ;;  %s3004_s11 = int_to_ptr.hbm [resolvable:$true] %s3003_s11 }
  0x19   :  { %228 = vmatpush.msra.mxu3 %v3214_v4  ;;  %v3253_v33 = vsub.f32 %v102_v16, %v3241_v24  ;;  %v3256_v34 = vsub.f32 %v101_v17, %v3243_v25  ;;  %v3259_v35 = vsub.f32 %v100_v18, %v3245_v26  ;;  %v3262_v36 = vsub.f32 %v99_v23, %v3247_v27 }
  0x1a   :  { %4228 = vst [vmem:[#allocation17_spill] sm:$0xff] %v3231_v15  ;;  %199 = vmatpush.msra.mxu2 %v166_v9  ;;  %v162_v19 = vsub.f32 %v160_v8, %v161_v13  ;;  %v3235_v20 = vand.u32 4294901760, %v3227_v12  ;;  %259 = vmatpush.msrb.mxu0 %v161_v13  ;;  %v168_v21 = vsub.f32 %v166_v9, %v167_v14  ;;  %v3238_v22 = vand.u32 4294901760, %v3231_v15 }
  0x1b   :  { %202 = vmatmul.f32.vlgmr.msra.gmra.mxu2 %v3227_v12  ;;  %4230 = vst [vmem:[#allocation19_spill] sm:$0xff] %v3259_v35  ;;  %v3269_v41 = vand.u32 4294901760, %v98_v28  ;;  %v3271_v42 = vand.u32 4294901760, %v97_v29  ;;  %v3274_v43 = vand.u32 4294901760, %v3253_v33  ;;  %v3277_v44 = vand.u32 4294901760, %v3256_v34 }
  0x1c   :  { %4229 = vst [vmem:[#allocation18_spill] sm:$0xff] %v3238_v22  ;;  %v163_v30 = vand.u32 4294901760, %v162_v19  ;;  %v131_v31 = vsub.f32 %v3227_v12, %v3235_v20  ;;  %232 = vmatmul.f32.vlgmr.msra.gmra.mxu3 %v3235_v20  ;;  %v169_v32 = vand.u32 4294901760, %v168_v21  ;;  %263 = vmatpush.msrb.mxu0 %v167_v14  ;;  %v139_v40 = vsub.f32 %v3231_v15, %v3238_v22 }
  0x1d   :  { %4231 = vst [vmem:[#allocation20_spill] sm:$0xff] %v3262_v36  ;;  %301 = vmatpush.msrb.mxu2 %v3241_v24  ;;  %v3280_v45 = vand.u32 4294901760, %v3259_v35  ;;  %v3283_v46 = vand.u32 4294901760, %v3262_v36  ;;  %v3288_v47 = vsub.f32 %v98_v28, %v3269_v41  ;;  %v3291_v48 = vsub.f32 %v97_v29, %v3271_v42 }
  0x1e   :  { %164 = vmatpush.msra.mxu1 %v163_v30  ;;  %v3265_v39 = vand.u32 4294901760, %v131_v31  ;;  %4232 = vst [vmem:[#allocation21_spill] sm:$0xff] %v3274_v43  ;;  %v3293_v49 = vand.u32 4294901760, %v96_v37  ;;  %v3295_v50 = vand.u32 4294901760, %v95_v38  ;;  %v352_v51 = vsub.f32 %v3253_v33, %v3274_v43 }
  0x1f   :  { %4233 = vst [vmem:[#allocation22_spill] sm:$0xff] %v3277_v44  ;;  %303 = vmatpush.msrb.mxu2 %v3243_v25  ;;  %v358_v52 = vsub.f32 %v3256_v34, %v3277_v44  ;;  %v364_v53 = vsub.f32 %v3259_v35, %v3280_v45  ;;  %v370_v54 = vsub.f32 %v3262_v36, %v3283_v46  ;;  %v3308_v55 = vand.u32 4294901760, %v3288_v47 }
  0x20   :  { %4234 = vst [vmem:[#allocation23_spill] sm:$0xff] %v3280_v45  ;;  %133 = vmatmul.f32.vlgmr.msra.gmra.mxu0 %v3265_v39  ;;  %170 = vmatpush.msra.mxu1 %v169_v32  ;;  %v3311_v56 = vand.u32 4294901760, %v3291_v48  ;;  %v3315_v57 = vsub.f32 %v96_v37, %v3293_v49  ;;  %v3318_v61 = vand.u32 4294901760, %v352_v51  ;;  %v3323_v63 = vsub.f32 %v95_v38, %v3295_v50 }
  0x21   :  { %4235 = vst [vmem:[#allocation24_spill] sm:$0xff] %v3283_v46  ;;  %172 = vmatmul.f32.vlgmr.msra.gmra.mxu1 %v3222_v10  ;;  %305 = vmatpush.msrb.mxu2 %v3245_v26  ;;  %v3320_v62 = vand.u32 4294901760, %v358_v52  ;;  %v3326_v2 = vand.u32 4294901760, %v139_v40  ;;  %v376_v5 = vsub.f32 %v3288_v47, %v3308_v55  ;;  %v3339_v8 = vand.u32 4294901760, %v94_v58 }
  0x22   :  { %4236 = vst [vmem:[#allocation25_spill] sm:$0xff] %v3288_v47  ;;  %288 = vmatpush.msrb.mxu1 %v3211_v3  ;;  %456 = vmatpush.msra.mxu0 %v3253_v33  ;;  %v3330_v3 = vand.u32 4294901760, %v364_v53  ;;  %v3336_v7 = vand.u32 4294901760, %v3315_v57  ;;  %v3341_v9 = vand.u32 4294901760, %v93_v59  ;;  %v3343_v13 = vand.u32 4294901760, %v92_v60 }
  0x23   :  { %4237 = vst [vmem:[#allocation26_spill] sm:$0xff] %v3291_v48  ;;  %207 = vmatmul.f32.gmra.mxu2 %v3231_v15  ;;  %354 = vmatpush.msrb.mxu3 %v3318_v61  ;;  %v382_v14 = vsub.f32 %v3291_v48, %v3311_v56  ;;  %v3353_v16 = vand.u32 4294901760, %v3323_v63  ;;  %v3357_v17 = vsub.f32 %v94_v58, %v3339_v8  ;;  %v3362_v19 = vand.u32 4294901760, %v91_v6 }
  0x24   :  { %4238 = vst [vmem:[#allocation27_spill] sm:$0xff] %v3308_v55  ;;  %238 = vmatmul.f32.gmra.mxu3 %v3238_v22  ;;  %290 = vmatpush.msrb.mxu1 %v3214_v4  ;;  %v3345_v4 = vand.u32 4294901760, %v370_v54  ;;  %v3360_v18 = vsub.f32 %v93_v59, %v3341_v9  ;;  %v3368_v21 = vand.u32 4294901760, %v376_v5  ;;  %v388_v23 = vsub.f32 %v3315_v57, %v3336_v7 }
  0x25   :  { %4239 = vst [vmem:[#allocation28_spill] sm:$0xff] %v3311_v56  ;;  %307 = vmatpush.msrb.mxu2 %v3247_v27  ;;  %459 = vmatpush.msra.mxu0 %v3256_v34  ;;  %v3373_v28 = vand.u32 4294901760, %v3357_v17  ;;  %v3376_v29 = vsub.f32 %v92_v60, %v3343_v13  ;;  %v3381_v30 = vand.u32 4294901760, %v382_v14  ;;  %v394_v31 = vsub.f32 %v3323_v63, %v3353_v16 }
  0x26   :  { %4240 = vst [vmem:[#allocation29_spill] sm:$0xff] %v3315_v57  ;;  %514 = vmatpush.msra.mxu1 %v3241_v24  ;;  %360 = vmatpush.msrb.mxu3 %v3320_v62  ;;  %v3386_v32 = vand.u32 4294901760, %v3360_v18  ;;  %v3389_v37 = vsub.f32 %v91_v6, %v3362_v19  ;;  %v3395_v38 = vand.u32 4294901760, %v388_v23  ;;  %v90_v23 = vld [vmem:[#allocation8 + $0x18] sm:$0xff] }
  0x27   :  { %4241 = vst [vmem:[#allocation30_spill] sm:$0xff] %v3323_v63  ;;  %309 = vmatpush.msrb.mxu2 %v3269_v41  ;;  %462 = vmatpush.msra.mxu0 %v3259_v35  ;;  %v400_v40 = vsub.f32 %v3357_v17, %v3373_v28  ;;  %v3400_v51 = vand.u32 4294901760, %v3376_v29  ;;  %v3406_v52 = vand.u32 4294901760, %v394_v31  ;;  %v3454_v31 = vand.u32 4294901760, %v90_v23 }
  0x28   :  { %4242 = vst [vmem:[#allocation31_spill] sm:$0xff] %v3336_v7  ;;  %141 = vmatmul.f32.gmra.mxu0 %v3326_v2  ;;  %516 = vmatpush.msra.mxu1 %v3243_v25  ;;  %v406_v53 = vsub.f32 %v3360_v18, %v3386_v32  ;;  %v3411_v54 = vand.u32 4294901760, %v3389_v37 }
  0x29   :  { %4243 = vst [vmem:[#allocation32_spill] sm:$0xff] %v3343_v13  ;;  %176 = vmatmul.f32.gmra.mxu1 %v3224_v11  ;;  %366 = vmatpush.msrb.mxu3 %v3330_v3  ;;  %v3418_v58 = vand.u32 4294901760, %v400_v40  ;;  %v412_v59 = vsub.f32 %v3376_v29, %v3400_v51  ;;  %v89_v40 = vld [vmem:[#allocation8 + $0x10] sm:$0xff] }
  0x2a   :  { %4244 = vst [vmem:[#allocation33_spill] sm:$0xff] %v3353_v16  ;;  %311 = vmatpush.msrb.mxu2 %v3271_v42  ;;  %518 = vmatpush.msra.mxu1 %v3245_v26  ;;  %v3425_v60 = vand.u32 4294901760, %v406_v53  ;;  %v418_v5 = vsub.f32 %v3389_v37, %v3411_v54  ;;  %v3457_v53 = vsub.f32 %v90_v23, %v3454_v31  ;;  %v87_v23 = vld [vmem:[#allocation8] sm:$0xff] }
  0x2b   :  { %4245 = vst [vmem:[#allocation34_spill] sm:$0xff] %v3357_v17  ;;  %372 = vmatpush.msrb.mxu3 %v3345_v4  ;;  %465 = vmatpush.msra.mxu0 %v3262_v36  ;;  %v3433_v6 = vand.u32 4294901760, %v412_v59  ;;  %v3459_v59 = vand.u32 4294901760, %v89_v40 }
  0x2c   :  { %4246 = vst [vmem:[#allocation35_spill] sm:$0xff] %v3360_v18  ;;  %313 = vmatpush.msrb.mxu2 %v3293_v49  ;;  %520 = vmatpush.msra.mxu1 %v3247_v27  ;;  %v3439_v14 = vand.u32 4294901760, %v418_v5  ;;  %v88_v5 = vld [vmem:[#allocation8 + $0x8] sm:$0xff]  ;;  %v3464_v1 = vand.u32 4294901760, %v3457_v53 }
  0x2d   :  { %4247 = vst [vmem:[#allocation36_spill] sm:$0xff] %v3362_v19  ;;  %378 = vmatpush.msrb.mxu3 %v3368_v21  ;;  %468 = vmatpush.msra.mxu0 %v3288_v47  ;;  %v3467_v0 = vsub.f32 %v89_v40, %v3459_v59  ;;  %v3482_v40 = vand.u32 4294901760, %v87_v23 }
  0x2e   :  { %4248 = vst [vmem:[#allocation37_spill] sm:$0xff] %v3373_v28  ;;  %315 = vmatpush.msrb.mxu2 %v3295_v50  ;;  %522 = vmatpush.msra.mxu1 %v3269_v41 }
  0x2f   :  { %4249 = vst [vmem:[#allocation38_spill] sm:$0xff] %v3376_v29  ;;  %384 = vmatpush.msrb.mxu3 %v3381_v30  ;;  %471 = vmatpush.msra.mxu0 %v3291_v48 }
  0x30   :  { %4250 = vst [vmem:[#allocation39_spill] sm:$0xff] %v3386_v32  ;;  %265 = vmatmul.f32.vlgmr.msrb.gmra.mxu0 %v3222_v10  ;;  %317 = vmatpush.msrb.mxu2 %v3339_v8 }
  0x31   :  { %4251 = vst [vmem:[#allocation40_spill] sm:$0xff] %v3389_v37  ;;  %292 = vmatmul.f32.vlgmr.msrb.gmra.mxu1 %v3222_v10  ;;  %390 = vmatpush.msrb.mxu3 %v3395_v38 }
  0x32   :  { %4252 = vst [vmem:[#allocation41_spill] sm:$0xff] %v3400_v51  ;;  %319 = vmatpush.msrb.mxu2 %v3341_v9  ;;  %524 = vmatpush.msra.mxu1 %v3271_v42 }
  0x33   :  { %4253 = vst [vmem:[#allocation42_spill] sm:$0xff] %v3411_v54  ;;  %396 = vmatpush.msrb.mxu3 %v3406_v52  ;;  %474 = vmatpush.msra.mxu0 %v3315_v57 }
  0x34   :  { %321 = vmatpush.msrb.mxu2 %v3343_v13  ;;  %4254 = vst [vmem:[#allocation43_spill] sm:$0xff] %v3433_v6  ;;  %526 = vmatpush.msra.mxu1 %v3293_v49 }
  0x35   :  { %402 = vmatpush.msrb.mxu3 %v3418_v58  ;;  %477 = vmatpush.msra.mxu0 %v3323_v63  ;;  %4255 = vst [vmem:[#allocation44_spill] sm:$0xff] %v3439_v14 }
  0x36   :  { %323 = vmatpush.msrb.mxu2 %v3362_v19  ;;  %528 = vmatpush.msra.mxu1 %v3295_v50  ;;  %4256 = vst [vmem:[#allocation45_spill] sm:$0xff] %v3454_v31 }
  0x37   :  { %408 = vmatpush.msrb.mxu3 %v3425_v60  ;;  %480 = vmatpush.msra.mxu0 %v3357_v17  ;;  %4257 = vst [vmem:[#allocation46_spill] sm:$0xff] %v3457_v53 }
  0x38   :  { %269 = vmatmul.f32.gmra.mxu0 %v3224_v11  ;;  %530 = vmatpush.msra.mxu1 %v3339_v8  ;;  %4258 = vst [vmem:[#allocation47_spill] sm:$0xff] %v3459_v59 }
  0x39   :  { %296 = vmatmul.f32.gmra.mxu1 %v3224_v11  ;;  %414 = vmatpush.msrb.mxu3 %v3433_v6  ;;  %4259 = vst [vmem:[#allocation48_spill] sm:$0xff] %v3464_v1 }
  0x3a   :  { %483 = vmatpush.msra.mxu0 %v3360_v18  ;;  %532 = vmatpush.msra.mxu1 %v3341_v9  ;;  %4260 = vst [vmem:[#allocation49_spill] sm:$0xff] %v3467_v0  ;;  %v3477_v18 = vand.u32 4294901760, %v3467_v0 }
  0x3b   :  { %420 = vmatpush.msrb.mxu3 %v3439_v14  ;;  %325 = vmatpush.msrb.mxu2 %v3454_v31  ;;  %4264 = vst [vmem:[#allocation53_spill] sm:$0xff] %v3482_v40  ;;  %v3495_v14 = vsub.f32 %v87_v23, %v3482_v40 }
  0x3c   :  { %486 = vmatpush.msra.mxu0 %v3376_v29  ;;  %534 = vmatpush.msra.mxu1 %v3343_v13  ;;  %v424_v29 = vsub.f32 %v3457_v53, %v3464_v1  ;;  %4262 = vst [vmem:[#allocation51_spill] sm:$0xff] %v3477_v18  ;;  %v430_v22 = vsub.f32 %v3467_v0, %v3477_v18 }
  0x3d   :  { %327 = vmatpush.msrb.mxu2 %v3459_v59  ;;  %4267 = vst [vmem:[#allocation56_spill] sm:$0xff] %v3495_v14 }
  0x3e   :  { %489 = vmatpush.msra.mxu0 %v3389_v37  ;;  %536 = vmatpush.msra.mxu1 %v3362_v19  ;;  %v3469_v37 = vand.u32 4294901760, %v88_v5  ;;  %v3487_v63 = vand.u32 4294901760, %v424_v29  ;;  %v3502_v29 = vand.u32 4294901760, %v430_v22 }
  0x40   :  { %538 = vmatpush.msra.mxu1 %v3454_v31  ;;  %4261 = vst [vmem:[#allocation50_spill] sm:$0xff] %v3469_v37  ;;  %492 = vmatpush.msra.mxu0 %v3457_v53  ;;  %v3480_v17 = vsub.f32 %v88_v5, %v3469_v37 }
  0x41   :  { %329 = vmatpush.msrb.mxu2 %v3469_v37  ;;  %4265 = vst [vmem:[#allocation54_spill] sm:$0xff] %v3487_v63  ;;  %426 = vmatpush.msrb.mxu3 %v3487_v63 }
  0x42   :  { %540 = vmatpush.msra.mxu1 %v3459_v59  ;;  %4263 = vst [vmem:[#allocation52_spill] sm:$0xff] %v3480_v17  ;;  %495 = vmatpush.msra.mxu0 %v3467_v0  ;;  %v3492_v53 = vand.u32 4294901760, %v3480_v17  ;;  %v3507_v0 = vand.u32 4294901760, %v3495_v14 }
  0x43   :  { %331 = vmatpush.msrb.mxu2 %v3482_v40  ;;  %4268 = vst [vmem:[#allocation57_spill] sm:$0xff] %v3502_v29  ;;  %432 = vmatpush.msrb.mxu3 %v3502_v29 }
  0x44   :  { %542 = vmatpush.msra.mxu1 %v3469_v37  ;;  %4266 = vst [vmem:[#allocation55_spill] sm:$0xff] %v3492_v53  ;;  %498 = vmatpush.msra.mxu0 %v3480_v17  ;;  %v436_v5 = vsub.f32 %v3480_v17, %v3492_v53 }
  0x45   :  { %561 = vmatpush.msra.mxu2 %v3274_v43  ;;  %4269 = vst [vmem:[#allocation58_spill] sm:$0xff] %v3507_v0  ;;  %v442_v43 = vsub.f32 %v3495_v14, %v3507_v0 }
  0x46   :  { %544 = vmatpush.msra.mxu1 %v3482_v40  ;;  %501 = vmatpush.msra.mxu0 %v3495_v14  ;;  %v3512_v23 = vand.u32 4294901760, %v436_v5 }
  0x47   :  { %565 = vmatpush.msra.mxu2 %v3277_v44  ;;  %v3518_v22 = vand.u32 4294901760, %v442_v43  ;;  %v3544_v43 = vld [vmem:[#allocation5 + $0x8] sm:$0xff] }
  0x48   :  { %4270 = vst [vmem:[#allocation59_spill] sm:$0xff] %v3512_v23  ;;  %438 = vmatpush.msrb.mxu3 %v3512_v23  ;;  %v686_v5 = vand.u32 4294901760, %v3544_v43 }
  0x49   :  { %569 = vmatpush.msra.mxu2 %v3280_v45  ;;  %4271 = vst [vmem:[#allocation60_spill] sm:$0xff] %v3518_v22 }
  0x4a   :  { %444 = vmatpush.msrb.mxu3 %v3518_v22  ;;  %4272 = vst [vmem:[#allocation61_spill] sm:$0xff] %v3544_v43  ;;  %687 = vmatpush.msrb.mxu0 %v686_v5 }
  0x4b   :  { %573 = vmatpush.msra.mxu2 %v3283_v46 }
  0x4c   :  { %632 = vmatpush.msra.mxu3 %v3241_v24 }
  0x4d   :  { %577 = vmatpush.msra.mxu2 %v3308_v55 }
  0x4e   :  { %634 = vmatpush.msra.mxu3 %v3243_v25 }
  0x4f   :  { %581 = vmatpush.msra.mxu2 %v3311_v56 }
  0x50   :  { %636 = vmatpush.msra.mxu3 %v3245_v26 }
  0x51   :  { %585 = vmatpush.msra.mxu2 %v3336_v7 }
  0x52   :  { %638 = vmatpush.msra.mxu3 %v3247_v27 }
  0x53   :  { %589 = vmatpush.msra.mxu2 %v3353_v16 }
  0x54   :  { %640 = vmatpush.msra.mxu3 %v3269_v41 }
  0x55   :  { %593 = vmatpush.msra.mxu2 %v3373_v28 }
  0x56   :  { %642 = vmatpush.msra.mxu3 %v3271_v42 }
  0x57   :  { %597 = vmatpush.msra.mxu2 %v3386_v32 }
  0x58   :  { %644 = vmatpush.msra.mxu3 %v3293_v49 }
  0x59   :  { %601 = vmatpush.msra.mxu2 %v3400_v51 }
  0x5a   :  { %646 = vmatpush.msra.mxu3 %v3295_v50 }
  0x5b   :  { %605 = vmatpush.msra.mxu2 %v3411_v54  ;;  %v3549_v54 = vld [vmem:[#allocation5] sm:$0xff] }
  0x5c   :  { %648 = vmatpush.msra.mxu3 %v3339_v8  ;;  %4273 = vst [vmem:[#allocation62_spill] sm:$0xff] %v3549_v54 }
  0x5d   :  { %609 = vmatpush.msra.mxu2 %v3464_v1  ;;  %v688_v1 = vand.u32 4294901760, %v3549_v54 }
  0x5e   :  { %650 = vmatpush.msra.mxu3 %v3341_v9 }
  0x5f   :  { %613 = vmatpush.msra.mxu2 %v3477_v18  ;;  %v722_v18 = vsub.f32 %v3544_v43, %v686_v5  ;;  %689 = vmatpush.msrb.mxu0 %v688_v1  ;;  %v728_v28 = vsub.f32 %v3549_v54, %v688_v1 }
  0x60   :  { %652 = vmatpush.msra.mxu3 %v3343_v13 }
  0x61   :  { %617 = vmatpush.msra.mxu2 %v3492_v53  ;;  %v723_v53 = vand.u32 4294901760, %v722_v18 }
  0x62   :  { %654 = vmatpush.msra.mxu3 %v3362_v19 }
  0x63   :  { %621 = vmatpush.msra.mxu2 %v3507_v0  ;;  %v724_v16 = vsub.f32 %v722_v18, %v723_v53  ;;  %v729_v0 = vand.u32 4294901760, %v728_v28 }
  0x64   :  { %656 = vmatpush.msra.mxu3 %v3454_v31 }
  0x65   :  { %v725_v56 = vand.u32 4294901760, %v724_v16  ;;  %v730_v55 = vsub.f32 %v728_v28, %v729_v0 }
  0x66   :  { %658 = vmatpush.msra.mxu3 %v3459_v59 }
  0x67   :  { %726 = vmatpush.msrb.mxu1 %v725_v56  ;;  %v731_v46 = vand.u32 4294901760, %v730_v55 }
  0x68   :  { %660 = vmatpush.msra.mxu3 %v3469_v37 }
  0x69   :  { %732 = vmatpush.msrb.mxu1 %v731_v46 }
  0x6a   :  { %662 = vmatpush.msra.mxu3 %v3482_v40 }
  0x9d   :  { %v134_v51 = vpop.f32.mrf.mxu0 }
  0x9e   :  { %v173_v32 = vpop.f32.mrf.mxu1  ;;  %v203_v7 = vpop.f32.mrf.mxu2 }
  0x9f   :  { %v174_v14 = vadd.f32 %v173_v32, %v134_v51  ;;  %v233_v45 = vpop.f32.mrf.mxu3 }
  0xa1   :  { %v204_v44 = vadd.f32 %v203_v7, %v174_v14  ;;  %v4280_v14 = vld [vmem:[#allocation45_spill] sm:$0xff] }
  0xa3   :  { %v234_v22 = vadd.f32 %v233_v45, %v204_v44 }
  0xa5   :  { %v142_v43 = vpop.f32.mrf.mxu0 }
  0xa6   :  { %v177_v17 = vpop.f32.mrf.mxu1  ;;  %v208_v54 = vpop.f32.mrf.mxu2 }
  0xa7   :  { %v178_v23 = vadd.f32 %v177_v17, %v142_v43  ;;  %v239_v16 = vpop.f32.mrf.mxu3  ;;  %v4288_v43 = vld [vmem:[#allocation38_spill] sm:$0xff] }
  0xa9   :  { %v209_v31 = vadd.f32 %v208_v54, %v178_v23  ;;  %v4286_v23 = vld [vmem:[#allocation50_spill] sm:$0xff] }
  0xab   :  { %v240_v40 = vadd.f32 %v239_v16, %v209_v31  ;;  %v4281_v31 = vld [vmem:[#allocation34_spill] sm:$0xff]  ;;  %v4290_v16 = vld [vmem:[#allocation40_spill] sm:$0xff] }
  0xad   :  { %v266_v59 = vpop.f32.mrf.mxu0 }
  0xae   :  { %v267_v29 = vadd.f32 %v266_v59, %v234_v22  ;;  %v293_v37 = vpop.f32.mrf.mxu1  ;;  %v4283_v59 = vld [vmem:[#allocation47_spill] sm:$0xff]  ;;  %v4287_v22 = vld [vmem:[#allocation60_spill] sm:$0xff] }
  0xb0   :  { %v294_v63 = vadd.f32 %v293_v37, %v267_v29  ;;  %v4285_v29 = vld [vmem:[#allocation35_spill] sm:$0xff] }
  0xb2   :  { %v332_v19 = vand.u32 4294901760, %v294_v63 }
  0xb4   :  { %v333_v15 = vsub.f32 %v294_v63, %v332_v19  ;;  %446 = vmatmul.f32.vlgmr.msrb.gmra.mxu3 %v332_v19 }
  0xb5   :  { %v270_v32 = vpop.f32.mrf.mxu0  ;;  %850 = vmatpush.msrb.mxu3 %v686_v5 }
  0xb6   :  { %v271_v55 = vadd.f32 %v270_v32, %v240_v40  ;;  %504 = vmatmul.f32.vlgmr.msra.gmra.mxu0 %v333_v15  ;;  %v297_v56 = vpop.f32.mrf.mxu1  ;;  %v334_v46 = vand.u32 4294901760, %v333_v15  ;;  %v4284_v40 = vld [vmem:[#allocation59_spill] sm:$0xff]  ;;  %v4291_v32 = vld [vmem:[#allocation21_spill] sm:$0xff] }
  0xb7   :  { %758 = vmatpush.msra.mxu0 %v722_v18  ;;  %852 = vmatpush.msrb.mxu3 %v688_v1  ;;  %v4277_v18 = vld [vmem:[#allocation18_spill] sm:$0xff] }
  0xb8   :  { %v298_v44 = vadd.f32 %v297_v56, %v271_v55  ;;  %548 = vmatmul.f32.vlgmr.msra.gmra.mxu1 %v334_v46  ;;  %v335_v45 = vsub.f32 %v333_v15, %v334_v46  ;;  %v4276_v15 = vld [vmem:[#allocation36_spill] sm:$0xff]  ;;  %v4292_v55 = vld [vmem:[#allocation46_spill] sm:$0xff]  ;;  %v4294_v46 = vld [vmem:[#allocation49_spill] sm:$0xff] }
  0xb9   :  { %788 = vmatpush.msra.mxu1 %v686_v5  ;;  %761 = vmatpush.msra.mxu0 %v728_v28  ;;  %v4279_v28 = vld [vmem:[#allocation54_spill] sm:$0xff]  ;;  %v4289_v5 = vld [vmem:[#allocation53_spill] sm:$0xff] }
  0xba   :  { %v340_v7 = vand.u32 4294901760, %v298_v44  ;;  %v336_v17 = vand.u32 4294901760, %v335_v45  ;;  %v4293_v56 = vld [vmem:[#allocation22_spill] sm:$0xff]  ;;  %v4296_v45 = vld [vmem:[#allocation52_spill] sm:$0xff] }
  0xbb   :  { %790 = vmatpush.msra.mxu1 %v688_v1  ;;  %v4275_v1 = vld [vmem:[#allocation44_spill] sm:$0xff] }
  0xbc   :  { %v341_v37 = vsub.f32 %v298_v44, %v340_v7  ;;  %337 = vmatmul.f32.vlgmr.msrb.gmra.mxu2 %v336_v17  ;;  %450 = vmatmul.f32.gmra.mxu3 %v340_v7  ;;  %v4295_v44 = vld [vmem:[#allocation23_spill] sm:$0xff]  ;;  %v4298_v17 = vld [vmem:[#allocation56_spill] sm:$0xff] }
  0xbd   :  { %821 = vmatpush.msrb.mxu2 %v723_v53  ;;  %v4282_v53 = vld [vmem:[#allocation57_spill] sm:$0xff] }
  0xbe   :  { %509 = vmatmul.f32.gmra.mxu0 %v341_v37  ;;  %v342_v63 = vand.u32 4294901760, %v341_v37 }
  0xbf   :  { %825 = vmatpush.msrb.mxu2 %v729_v0  ;;  %v4274_v0 = vld [vmem:[#allocation17_spill] sm:$0xff] }
  0xc0   :  { %554 = vmatmul.f32.gmra.mxu1 %v342_v63  ;;  %v343_v51 = vsub.f32 %v341_v37, %v342_v63  ;;  %v4299_v37 = vld [vmem:[#allocation27_spill] sm:$0xff]  ;;  %v4300_v63 = vld [vmem:[#allocation28_spill] sm:$0xff] }
  0xc2   :  { %v344_v54 = vand.u32 4294901760, %v343_v51  ;;  %v4301_v51 = vld [vmem:[#allocation31_spill] sm:$0xff] }
  0xc4   :  { %345 = vmatmul.f32.gmra.mxu2 %v344_v54  ;;  %664 = vmatmul.f32.vlgmr.msra.gmra.mxu3 %v332_v19  ;;  %v4302_v54 = vld [vmem:[#allocation33_spill] sm:$0xff] }
  0xc5   :  { %1076 = vmatpush.msra.mxu3 %v3241_v24 }
  0xc6   :  { %695 = vmatmul.f32.vlgmr.msrb.gmra.mxu0 %v3265_v39 }
  0xc7   :  { %863 = vmatpush.msrb.mxu0 %v3241_v24  ;;  %1078 = vmatpush.msra.mxu3 %v3243_v25 }
  0xc8   :  { %734 = vmatmul.f32.vlgmr.msrb.gmra.mxu1 %v3222_v10 }
  0xc9   :  { %916 = vmatpush.msrb.mxu1 %v3318_v61  ;;  %865 = vmatpush.msrb.mxu0 %v3243_v25 }
  0xca   :  { %1080 = vmatpush.msra.mxu3 %v3245_v26 }
  0xcb   :  { %922 = vmatpush.msrb.mxu1 %v3320_v62  ;;  %867 = vmatpush.msrb.mxu0 %v3245_v26 }
  0xcc   :  { %623 = vmatmul.f32.vlgmr.msra.gmra.mxu2 %v332_v19  ;;  %668 = vmatmul.f32.gmra.mxu3 %v340_v7  ;;  %v4278_v19 = vld [vmem:[#allocation30_spill] sm:$0xff] }
  0xcd   :  { %928 = vmatpush.msrb.mxu1 %v3330_v3  ;;  %869 = vmatpush.msrb.mxu0 %v3247_v27 }
  0xce   :  { %703 = vmatmul.f32.gmra.mxu0 %v3326_v2  ;;  %1018 = vmatpush.msra.mxu2 %v3253_v33 }
  0xcf   :  { %934 = vmatpush.msrb.mxu1 %v3345_v4  ;;  %871 = vmatpush.msrb.mxu0 %v3269_v41 }
  0xd0   :  { %738 = vmatmul.f32.gmra.mxu1 %v3224_v11  ;;  %1021 = vmatpush.msra.mxu2 %v3256_v34 }
  0xd1   :  { %940 = vmatpush.msrb.mxu1 %v3368_v21  ;;  %873 = vmatpush.msrb.mxu0 %v3271_v42 }
  0xd2   :  { %1024 = vmatpush.msra.mxu2 %v3259_v35  ;;  %1082 = vmatpush.msra.mxu3 %v3247_v27 }
  0xd3   :  { %946 = vmatpush.msrb.mxu1 %v3381_v30  ;;  %875 = vmatpush.msrb.mxu0 %v3293_v49 }
  0xd4   :  { %627 = vmatmul.f32.gmra.mxu2 %v340_v7  ;;  %854 = vmatmul.f32.vlgmr.msrb.gmra.mxu3 %v3222_v10  ;;  %v4297_v7 = vld [vmem:[#allocation24_spill] sm:$0xff] }
  0xd5   :  { %952 = vmatpush.msrb.mxu1 %v3395_v38  ;;  %877 = vmatpush.msrb.mxu0 %v3295_v50 }
  0xd6   :  { %764 = vmatmul.f32.vlgmr.msra.gmra.mxu0 %v3227_v12  ;;  %1027 = vmatpush.msra.mxu2 %v3262_v36 }
  0xd7   :  { %958 = vmatpush.msrb.mxu1 %v3406_v52  ;;  %879 = vmatpush.msrb.mxu0 %v3339_v8 }
  0xd8   :  { %794 = vmatmul.f32.vlgmr.msra.gmra.mxu1 %v3235_v20  ;;  %1030 = vmatpush.msra.mxu2 %v3288_v47 }
  0xd9   :  { %964 = vmatpush.msrb.mxu1 %v3418_v58  ;;  %881 = vmatpush.msrb.mxu0 %v3341_v9 }
  0xda   :  { %1033 = vmatpush.msra.mxu2 %v3291_v48  ;;  %1084 = vmatpush.msra.mxu3 %v3269_v41 }
  0xdb   :  { %970 = vmatpush.msrb.mxu1 %v3425_v60  ;;  %883 = vmatpush.msrb.mxu0 %v3343_v13 }
  0xdc   :  { %827 = vmatmul.f32.vlgmr.msrb.gmra.mxu2 %v3222_v10  ;;  %858 = vmatmul.f32.gmra.mxu3 %v3224_v11 }
  0xdd   :  { %976 = vmatpush.msrb.mxu1 %v3433_v6  ;;  %1036 = vmatpush.msra.mxu2 %v3315_v57 }
  0xde   :  { %769 = vmatmul.f32.gmra.mxu0 %v4274_v0  ;;  %1086 = vmatpush.msra.mxu3 %v3271_v42 }
  0xdf   :  { %982 = vmatpush.msrb.mxu1 %v4275_v1  ;;  %885 = vmatpush.msrb.mxu0 %v4276_v15 }
  0xe0   :  { %800 = vmatmul.f32.gmra.mxu1 %v4277_v18  ;;  %1039 = vmatpush.msra.mxu2 %v4278_v19 }
  0xe1   :  { %988 = vmatpush.msrb.mxu1 %v4279_v28  ;;  %1088 = vmatpush.msra.mxu3 %v3293_v49 }
  0xe2   :  { %887 = vmatpush.msrb.mxu0 %v4280_v14  ;;  %1042 = vmatpush.msra.mxu2 %v4281_v31 }
  0xe3   :  { %994 = vmatpush.msrb.mxu1 %v4282_v53  ;;  %1090 = vmatpush.msra.mxu3 %v3295_v50 }
  0xe4   :  { %831 = vmatmul.f32.gmra.mxu2 %v3224_v11  ;;  %889 = vmatpush.msrb.mxu0 %v4283_v59 }
  0xe5   :  { %1000 = vmatpush.msrb.mxu1 %v4284_v40  ;;  %1045 = vmatpush.msra.mxu2 %v4285_v29 }
  0xe6   :  { %1092 = vmatpush.msra.mxu3 %v3339_v8  ;;  %891 = vmatpush.msrb.mxu0 %v4286_v23 }
  0xe7   :  { %1006 = vmatpush.msrb.mxu1 %v4287_v22  ;;  %1048 = vmatpush.msra.mxu2 %v4288_v43  ;;  %v4315_v43 = vld [vmem:[#allocation15_spill] sm:$0xff] }
  0xe8   :  { %1094 = vmatpush.msra.mxu3 %v3341_v9  ;;  %893 = vmatpush.msrb.mxu0 %v4289_v5 }
  0xe9   :  { %1194 = vmatpush.msra.mxu1 %v3241_v24  ;;  %1051 = vmatpush.msra.mxu2 %v4290_v16 }
  0xea   :  { %1096 = vmatpush.msra.mxu3 %v3343_v13  ;;  %1123 = vmatpush.msra.mxu0 %v4291_v32  ;;  %v1235_v32 = vmul.f32 %v4315_v43, %v4315_v43 }
  0xeb   :  { %1196 = vmatpush.msra.mxu1 %v3243_v25  ;;  %1054 = vmatpush.msra.mxu2 %v4292_v55 }
  0xec   :  { %1098 = vmatpush.msra.mxu3 %v4276_v15  ;;  %1127 = vmatpush.msra.mxu0 %v4293_v56 }
  0xed   :  { %1198 = vmatpush.msra.mxu1 %v3245_v26  ;;  %1057 = vmatpush.msra.mxu2 %v4294_v46 }
  0xee   :  { %1100 = vmatpush.msra.mxu3 %v4280_v14  ;;  %1131 = vmatpush.msra.mxu0 %v4295_v44 }
  0xef   :  { %1200 = vmatpush.msra.mxu1 %v3247_v27  ;;  %1060 = vmatpush.msra.mxu2 %v4296_v45  ;;  %v4304_v45 = vld [vmem:[#allocation39_spill] sm:$0xff] }
  0xf0   :  { %1102 = vmatpush.msra.mxu3 %v4283_v59  ;;  %1135 = vmatpush.msra.mxu0 %v4297_v7 }
  0xf1   :  { %1202 = vmatpush.msra.mxu1 %v3269_v41  ;;  %1063 = vmatpush.msra.mxu2 %v4298_v17  ;;  %v4303_v17 = vld [vmem:[#allocation37_spill] sm:$0xff] }
  0xf2   :  { %1104 = vmatpush.msra.mxu3 %v4286_v23  ;;  %1139 = vmatpush.msra.mxu0 %v4299_v37  ;;  %v4305_v37 = vld [vmem:[#allocation41_spill] sm:$0xff] }
  0xf3   :  { %1204 = vmatpush.msra.mxu1 %v3271_v42 }
  0xf4   :  { %1106 = vmatpush.msra.mxu3 %v4289_v5  ;;  %1143 = vmatpush.msra.mxu0 %v4300_v63  ;;  %v4306_v63 = vld [vmem:[#allocation42_spill] sm:$0xff] }
  0xf5   :  { %1206 = vmatpush.msra.mxu1 %v3293_v49 }
  0xf6   :  { %1147 = vmatpush.msra.mxu0 %v4301_v51  ;;  %v4307_v51 = vld [vmem:[#allocation48_spill] sm:$0xff] }
  0xf7   :  { %1208 = vmatpush.msra.mxu1 %v3295_v50 }
  0xf8   :  { %1151 = vmatpush.msra.mxu0 %v4302_v54  ;;  %v4308_v54 = vld [vmem:[#allocation51_spill] sm:$0xff] }
  0xf9   :  { %1210 = vmatpush.msra.mxu1 %v3339_v8 }
  0xfa   :  { %1155 = vmatpush.msra.mxu0 %v4303_v17  ;;  %v4309_v17 = vld [vmem:[#allocation55_spill] sm:$0xff] }
  0xfb   :  { %1212 = vmatpush.msra.mxu1 %v3341_v9 }
  0xfc   :  { %1159 = vmatpush.msra.mxu0 %v4304_v45  ;;  %v4310_v45 = vld [vmem:[#allocation58_spill] sm:$0xff] }
  0xfd   :  { %1214 = vmatpush.msra.mxu1 %v3343_v13 }
  0xfe   :  { %1163 = vmatpush.msra.mxu0 %v4305_v37 }
  0xff   :  { %1216 = vmatpush.msra.mxu1 %v4276_v15 }
 0x100   :  { %1167 = vmatpush.msra.mxu0 %v4306_v63 }
 0x101   :  { %1218 = vmatpush.msra.mxu1 %v4280_v14 }
 0x102   :  { %1171 = vmatpush.msra.mxu0 %v4307_v51 }
 0x103   :  { %1220 = vmatpush.msra.mxu1 %v4283_v59 }
 0x104   :  { %1175 = vmatpush.msra.mxu0 %v4308_v54 }
 0x105   :  { %1222 = vmatpush.msra.mxu1 %v4286_v23 }
 0x106   :  { %1179 = vmatpush.msra.mxu0 %v4309_v17  ;;  %v4316_v17 = vld [vmem:[#allocation16_spill] sm:$0xff] }
 0x107   :  { %1224 = vmatpush.msra.mxu1 %v4289_v5 }
 0x108   :  { %1183 = vmatpush.msra.mxu0 %v4310_v45  ;;  %v1234_v45 = vmul.f32 %v4316_v17, %v4316_v17 }
 0x10a   :  { %v3688_v23 = vand.u32 4294901760, %v1234_v45 }
 0x10c   :  { %v3693_v17 = vsub.f32 %v1234_v45, %v3688_v23 }
 0x133   :  { %v3666_v46 = vpop.f32.mrf.mxu0 }
 0x134   :  { %4311 = vst [vmem:[#allocation63_spill] sm:$0xff] %v3666_v46 }
 0x135   :  { %v3668_v37 = vpop.f32.mrf.mxu1 }
 0x136   :  { %4312 = vst [vmem:[#allocation64_spill] sm:$0xff] %v3668_v37  ;;  %v3680_v37 = vand.u32 4294901760, %v1235_v32 }
 0x137   :  { %v3670_v7 = vpop.f32.mrf.mxu3 }
 0x138   :  { %4313 = vst [vmem:[#allocation65_spill] sm:$0xff] %v3670_v7  ;;  %3015 = vmatpush.msrb.mxu2 %v3680_v37 }
 0x13a   :  { %3016 = vmatpush.msrb.mxu2 %v3688_v23 }
 0x13b   :  { %v510_v63 = vpop.f32.mrf.mxu0 }
 0x13d   :  { %v555_v55 = vpop.f32.mrf.mxu1 }
 0x13f   :  { %v3672_v44 = vpop.f32.mrf.mxu2  ;;  %v451_v51 = vpop.f32.mrf.mxu3 }
 0x140   :  { %4314 = vst [vmem:[#allocation66_spill] sm:$0xff] %v3672_v44  ;;  %v3686_v44 = vsub.f32 %v1235_v32, %v3680_v37 }
 0x142   :  { %v4195_v43 = vand.u32 4294901760, %v3686_v44 }
 0x143   :  { %v696_v16 = vpop.f32.mrf.mxu0 }
 0x145   :  { %v735_v56 = vpop.f32.mrf.mxu1 }
 0x146   :  { %v736_v45 = vadd.f32 %v735_v56, %v696_v16  ;;  %v4323_v16 = vld [vmem:[#allocation54_spill] sm:$0xff]  ;;  %v4324_v56 = vld [vmem:[#allocation36_spill] sm:$0xff] }
 0x147   :  { %v346_v54 = vpop.f32.mrf.mxu2  ;;  %v3678_v29 = vpop.f32.mrf.mxu3 }
 0x148   :  { %4317 = vst [vmem:[#allocation15_spill] sm:$0xff] %v3678_v29  ;;  %v452_v7 = vadd.f32 %v451_v51, %v346_v54  ;;  %v1288_v51 = vsub.f32 %v3686_v44, %v4195_v43  ;;  %v4203_v54 = vand.u32 4294901760, %v3693_v17 }
 0x14a   :  { %v511_v29 = vadd.f32 %v510_v63, %v452_v7  ;;  %v1289_v32 = vand.u32 4294901760, %v1288_v51  ;;  %v1294_v59 = vsub.f32 %v3693_v17, %v4203_v54 }
 0x14b   :  { %v704_v46 = vpop.f32.mrf.mxu0 }
 0x14c   :  { %v556_v57 = vadd.f32 %v555_v55, %v511_v29  ;;  %3017 = vmatpush.msrb.mxu3 %v1289_v32  ;;  %v1295_v48 = vand.u32 4294901760, %v1294_v59 }
 0x14d   :  { %v739_v5 = vpop.f32.mrf.mxu1 }
 0x14e   :  { %3018 = vmatpush.msrb.mxu3 %v1295_v48  ;;  %v740_v51 = vadd.f32 %v739_v5, %v704_v46  ;;  %v4322_v5 = vld [vmem:[#allocation19_spill] sm:$0xff]  ;;  %v4325_v46 = vld [vmem:[#allocation20_spill] sm:$0xff] }
 0x14f   :  { %v3682_v31 = vpop.f32.mrf.mxu2 }
 0x150   :  { %4318 = vst [vmem:[#allocation16_spill] sm:$0xff] %v3682_v31  ;;  %v669_v31 = vpop.f32.mrf.mxu3 }
 0x153   :  { %v765_v19 = vpop.f32.mrf.mxu0 }
 0x154   :  { %v766_v63 = vadd.f32 %v765_v19, %v736_v45  ;;  %v4332_v45 = vld [vmem:[#allocation29_spill] sm:$0xff] }
 0x155   :  { %v795_v7 = vpop.f32.mrf.mxu1 }
 0x156   :  { %v796_v47 = vadd.f32 %v795_v7, %v766_v63  ;;  %v4333_v7 = vld [vmem:[#allocation47_spill] sm:$0xff]  ;;  %v4334_v63 = vld [vmem:[#allocation30_spill] sm:$0xff] }
 0x157   :  { %v628_v22 = vpop.f32.mrf.mxu2 }
 0x158   :  { %v629_v14 = vadd.f32 %v628_v22, %v556_v57  ;;  %v855_v43 = vpop.f32.mrf.mxu3 }
 0x15a   :  { %v3702_v40 = vadd.f32 %v669_v31, %v629_v14 }
 0x15b   :  { %v770_v53 = vpop.f32.mrf.mxu0 }
 0x15c   :  { %v771_v28 = vadd.f32 %v770_v53, %v740_v51  ;;  %v4320_v53 = vand.u32 4294901760, %v3693_v17  ;;  %v4335_v51 = vld [vmem:[#allocation50_spill] sm:$0xff] }
 0x15d   :  { %v801_v54 = vpop.f32.mrf.mxu1 }
 0x15e   :  { %v802_v55 = vadd.f32 %v801_v54, %v771_v28  ;;  %v4319_v28 = vand.u32 4294901760, %v3686_v44  ;;  %v4330_v54 = vld [vmem:[#allocation26_spill] sm:$0xff] }
 0x15f   :  { %v828_v36 = vpop.f32.mrf.mxu2 }
 0x160   :  { %v829_v15 = vadd.f32 %v828_v36, %v796_v47  ;;  %v859_v57 = vpop.f32.mrf.mxu3 }
 0x162   :  { %v856_v35 = vadd.f32 %v855_v43, %v829_v15  ;;  %v4328_v43 = vld [vmem:[#allocation59_spill] sm:$0xff] }
 0x164   :  { %v894_v29 = vand.u32 4294901760, %v856_v35 }
 0x166   :  { %v895_v13 = vsub.f32 %v856_v35, %v894_v29  ;;  %1008 = vmatmul.f32.vlgmr.msrb.gmra.mxu1 %v894_v29 }
 0x167   :  { %v832_v59 = vpop.f32.mrf.mxu2  ;;  %1290 = vmatpush.msrb.mxu1 %v1289_v32  ;;  %v4331_v32 = vld [vmem:[#allocation60_spill] sm:$0xff] }
 0x168   :  { %v896_v22 = vand.u32 4294901760, %v895_v13  ;;  %v833_v19 = vadd.f32 %v832_v59, %v802_v55  ;;  %1066 = vmatmul.f32.vlgmr.msra.gmra.mxu2 %v895_v13  ;;  %v4337_v55 = vld [vmem:[#allocation53_spill] sm:$0xff]  ;;  %v4338_v59 = vld [vmem:[#allocation35_spill] sm:$0xff] }
 0x169   :  { %1322 = vmatpush.msra.mxu2 %v3686_v44  ;;  %1296 = vmatpush.msrb.mxu1 %v1295_v48  ;;  %v4326_v44 = vld [vmem:[#allocation57_spill] sm:$0xff] }
 0x16a   :  { %v897_v14 = vsub.f32 %v895_v13, %v896_v22  ;;  %v860_v31 = vadd.f32 %v859_v57, %v833_v19  ;;  %1110 = vmatmul.f32.vlgmr.msra.gmra.mxu3 %v896_v22  ;;  %v4339_v57 = vld [vmem:[#allocation21_spill] sm:$0xff]  ;;  %v4340_v22 = vld [vmem:[#allocation38_spill] sm:$0xff] }
 0x16b   :  { %1325 = vmatpush.msra.mxu2 %v3693_v17  ;;  %1352 = vmatpush.msra.mxu3 %v3680_v37  ;;  %v4329_v17 = vld [vmem:[#allocation45_spill] sm:$0xff]  ;;  %v4341_v19 = vld [vmem:[#allocation22_spill] sm:$0xff] }
 0x16c   :  { %v902_v36 = vand.u32 4294901760, %v860_v31  ;;  %v898_v47 = vand.u32 4294901760, %v897_v14  ;;  %v4342_v14 = vld [vmem:[#allocation40_spill] sm:$0xff] }
 0x16d   :  { %1354 = vmatpush.msra.mxu3 %v3688_v23 }
 0x16e   :  { %v903_v35 = vsub.f32 %v860_v31, %v902_v36  ;;  %899 = vmatmul.f32.vlgmr.msrb.gmra.mxu0 %v898_v47  ;;  %1012 = vmatmul.f32.gmra.mxu1 %v902_v36  ;;  %v4343_v31 = vld [vmem:[#allocation23_spill] sm:$0xff]  ;;  %v4345_v47 = vld [vmem:[#allocation24_spill] sm:$0xff] }
 0x16f   :  { %1251 = vmatpush.msrb.mxu0 %v3680_v37 }
 0x170   :  { %1071 = vmatmul.f32.gmra.mxu2 %v903_v35  ;;  %v904_v15 = vand.u32 4294901760, %v903_v35 }
 0x171   :  { %1253 = vmatpush.msrb.mxu0 %v3688_v23 }
 0x172   :  { %1116 = vmatmul.f32.gmra.mxu3 %v904_v15  ;;  %v905_v48 = vsub.f32 %v903_v35, %v904_v15  ;;  %v4346_v35 = vld [vmem:[#allocation49_spill] sm:$0xff]  ;;  %v4347_v15 = vld [vmem:[#allocation27_spill] sm:$0xff] }
 0x174   :  { %v906_v13 = vand.u32 4294901760, %v905_v48  ;;  %v4348_v48 = vld [vmem:[#allocation52_spill] sm:$0xff] }
 0x176   :  { %907 = vmatmul.f32.gmra.mxu0 %v906_v13  ;;  %1226 = vmatmul.f32.vlgmr.msra.gmra.mxu1 %v894_v29  ;;  %v4349_v13 = vld [vmem:[#allocation28_spill] sm:$0xff] }
 0x177   :  { %1414 = vmatpush.msra.mxu1 %v3680_v37  ;;  %v4327_v37 = vld [vmem:[#allocation25_spill] sm:$0xff] }
 0x178   :  { %1267 = vmatmul.f32.vlgmr.msrb.gmra.mxu2 %v3326_v2 }
 0x179   :  { %1416 = vmatpush.msra.mxu1 %v3688_v23  ;;  %1427 = vmatpush.msrb.mxu2 %v3241_v24  ;;  %v4321_v23 = vld [vmem:[#allocation32_spill] sm:$0xff] }
 0x17a   :  { %1302 = vmatmul.f32.vlgmr.msrb.gmra.mxu3 %v3224_v11 }
 0x17b   :  { %1480 = vmatpush.msrb.mxu3 %v3318_v61  ;;  %1429 = vmatpush.msrb.mxu2 %v3243_v25 }
 0x17d   :  { %1486 = vmatpush.msrb.mxu3 %v3320_v62  ;;  %1431 = vmatpush.msrb.mxu2 %v3245_v26 }
 0x17e   :  { %1185 = vmatmul.f32.vlgmr.msra.gmra.mxu0 %v894_v29  ;;  %1230 = vmatmul.f32.gmra.mxu1 %v902_v36  ;;  %v4336_v29 = vld [vmem:[#allocation34_spill] sm:$0xff] }
 0x17f   :  { %1385 = vmatpush.msra.mxu0 %v4319_v28  ;;  %1492 = vmatpush.msrb.mxu3 %v3330_v3  ;;  %v4350_v28 = vld [vmem:[#allocation56_spill] sm:$0xff] }
 0x180   :  { %1328 = vmatmul.f32.vlgmr.msra.gmra.mxu2 %v3227_v12 }
 0x181   :  { %1389 = vmatpush.msra.mxu0 %v4320_v53  ;;  %1498 = vmatpush.msrb.mxu3 %v3345_v4  ;;  %v4351_v53 = vld [vmem:[#allocation31_spill] sm:$0xff] }
 0x182   :  { %1358 = vmatmul.f32.vlgmr.msra.gmra.mxu3 %v3235_v20  ;;  %1433 = vmatpush.msrb.mxu2 %v3247_v27 }
 0x183   :  { %1504 = vmatpush.msrb.mxu3 %v3368_v21 }
 0x184   :  { %1435 = vmatpush.msrb.mxu2 %v3269_v41 }
 0x185   :  { %1510 = vmatpush.msrb.mxu3 %v3381_v30 }
 0x186   :  { %1189 = vmatmul.f32.gmra.mxu0 %v902_v36  ;;  %1298 = vmatmul.f32.vlgmr.msrb.gmra.mxu1 %v3222_v10  ;;  %v4344_v36 = vld [vmem:[#allocation46_spill] sm:$0xff] }
 0x187   :  { %1516 = vmatpush.msrb.mxu3 %v3395_v38  ;;  %1437 = vmatpush.msrb.mxu2 %v3271_v42 }
 0x188   :  { %1333 = vmatmul.f32.gmra.mxu2 %v4274_v0  ;;  %1640 = vmatpush.msrb.mxu1 %v3241_v24 }
 0x189   :  { %1522 = vmatpush.msrb.mxu3 %v3406_v52  ;;  %1439 = vmatpush.msrb.mxu2 %v3293_v49 }
 0x18a   :  { %1364 = vmatmul.f32.gmra.mxu3 %v4277_v18  ;;  %1642 = vmatpush.msrb.mxu1 %v3243_v25 }
 0x18b   :  { %1528 = vmatpush.msrb.mxu3 %v3418_v58  ;;  %1441 = vmatpush.msrb.mxu2 %v3295_v50 }
 0x18c   :  { %1644 = vmatpush.msrb.mxu1 %v3245_v26 }
 0x18d   :  { %1534 = vmatpush.msrb.mxu3 %v3425_v60  ;;  %1443 = vmatpush.msrb.mxu2 %v3339_v8 }
 0x18e   :  { %1259 = vmatmul.f32.vlgmr.msrb.gmra.mxu0 %v3265_v39  ;;  %1418 = vmatmul.f32.vlgmr.msra.gmra.mxu1 %v3222_v10 }
 0x18f   :  { %1582 = vmatpush.msrb.mxu0 %v3253_v33  ;;  %1540 = vmatpush.msrb.mxu3 %v3433_v6 }
 0x190   :  { %1646 = vmatpush.msrb.mxu1 %v3247_v27  ;;  %1445 = vmatpush.msrb.mxu2 %v3341_v9 }
 0x191   :  { %1585 = vmatpush.msrb.mxu0 %v3256_v34  ;;  %1546 = vmatpush.msrb.mxu3 %v4275_v1 }
 0x192   :  { %1648 = vmatpush.msrb.mxu1 %v3269_v41  ;;  %1447 = vmatpush.msrb.mxu2 %v4321_v23 }
 0x193   :  { %1588 = vmatpush.msrb.mxu0 %v4322_v5  ;;  %1552 = vmatpush.msrb.mxu3 %v4323_v16 }
 0x194   :  { %1650 = vmatpush.msrb.mxu1 %v3271_v42  ;;  %1449 = vmatpush.msrb.mxu2 %v4324_v56 }
 0x195   :  { %1591 = vmatpush.msrb.mxu0 %v4325_v46  ;;  %1558 = vmatpush.msrb.mxu3 %v4326_v44  ;;  %v4362_v44 = vld [vmem:[#allocation61_spill] sm:$0xff] }
 0x196   :  { %1391 = vmatmul.f32.vlgmr.msra.gmra.mxu0 %v3222_v10  ;;  %1422 = vmatmul.f32.gmra.mxu1 %v3224_v11 }
 0x197   :  { %1594 = vmatpush.msrb.mxu0 %v4327_v37  ;;  %1564 = vmatpush.msrb.mxu3 %v4328_v43 }
 0x198   :  { %1652 = vmatpush.msrb.mxu1 %v3293_v49  ;;  %1451 = vmatpush.msrb.mxu2 %v4329_v17 }
 0x199   :  { %1597 = vmatpush.msrb.mxu0 %v4330_v54  ;;  %1570 = vmatpush.msrb.mxu3 %v4331_v32 }
 0x19a   :  { %1654 = vmatpush.msrb.mxu1 %v3295_v50  ;;  %1453 = vmatpush.msrb.mxu2 %v4333_v7 }
 0x19b   :  { %1758 = vmatpush.msra.mxu3 %v3241_v24  ;;  %1600 = vmatpush.msrb.mxu0 %v4332_v45 }
 0x19c   :  { %1656 = vmatpush.msrb.mxu1 %v3339_v8  ;;  %1455 = vmatpush.msrb.mxu2 %v4335_v51 }
 0x19d   :  { %1760 = vmatpush.msra.mxu3 %v3243_v25  ;;  %1603 = vmatpush.msrb.mxu0 %v4334_v63 }
 0x19e   :  { %1395 = vmatmul.f32.gmra.mxu0 %v3224_v11  ;;  %1658 = vmatpush.msrb.mxu1 %v3341_v9 }
 0x19f   :  { %1762 = vmatpush.msra.mxu3 %v3245_v26  ;;  %1606 = vmatpush.msrb.mxu0 %v4336_v29 }
 0x1a0   :  { %1457 = vmatpush.msrb.mxu2 %v4337_v55  ;;  %1660 = vmatpush.msrb.mxu1 %v4321_v23 }
 0x1a1   :  { %1764 = vmatpush.msra.mxu3 %v3247_v27  ;;  %1609 = vmatpush.msrb.mxu0 %v4338_v59 }
 0x1a2   :  { %1687 = vmatpush.msra.mxu2 %v4339_v57  ;;  %1662 = vmatpush.msrb.mxu1 %v4324_v56 }
 0x1a3   :  { %1766 = vmatpush.msra.mxu3 %v3269_v41  ;;  %1612 = vmatpush.msrb.mxu0 %v4340_v22 }
 0x1a4   :  { %1691 = vmatpush.msra.mxu2 %v4341_v19  ;;  %1664 = vmatpush.msrb.mxu1 %v4329_v17 }
 0x1a5   :  { %1768 = vmatpush.msra.mxu3 %v3271_v42  ;;  %1615 = vmatpush.msrb.mxu0 %v4342_v14 }
 0x1a6   :  { %1695 = vmatpush.msra.mxu2 %v4343_v31  ;;  %1666 = vmatpush.msrb.mxu1 %v4333_v7  ;;  %v4359_v31 = vld [vmem:[#allocation55_spill] sm:$0xff] }
 0x1a7   :  { %1770 = vmatpush.msra.mxu3 %v3293_v49  ;;  %1618 = vmatpush.msrb.mxu0 %v4344_v36 }
 0x1a8   :  { %1699 = vmatpush.msra.mxu2 %v4345_v47  ;;  %1668 = vmatpush.msrb.mxu1 %v4335_v51  ;;  %v4352_v47 = vld [vmem:[#allocation33_spill] sm:$0xff] }
 0x1a9   :  { %1772 = vmatpush.msra.mxu3 %v3295_v50  ;;  %1621 = vmatpush.msrb.mxu0 %v4346_v35 }
 0x1aa   :  { %1703 = vmatpush.msra.mxu2 %v4347_v15  ;;  %1670 = vmatpush.msrb.mxu1 %v4337_v55  ;;  %v4353_v15 = vld [vmem:[#allocation37_spill] sm:$0xff] }
 0x1ab   :  { %1774 = vmatpush.msra.mxu3 %v3339_v8  ;;  %1624 = vmatpush.msrb.mxu0 %v4348_v48  ;;  %v4354_v48 = vld [vmem:[#allocation39_spill] sm:$0xff] }
 0x1ac   :  { %1707 = vmatpush.msra.mxu2 %v4349_v13  ;;  %v4355_v13 = vld [vmem:[#allocation41_spill] sm:$0xff] }
 0x1ad   :  { %1776 = vmatpush.msra.mxu3 %v3341_v9  ;;  %1627 = vmatpush.msrb.mxu0 %v4350_v28  ;;  %v4356_v28 = vld [vmem:[#allocation42_spill] sm:$0xff] }
 0x1ae   :  { %1711 = vmatpush.msra.mxu2 %v4351_v53  ;;  %v4357_v53 = vld [vmem:[#allocation48_spill] sm:$0xff] }
 0x1af   :  { %1778 = vmatpush.msra.mxu3 %v4321_v23 }
 0x1b0   :  { %1715 = vmatpush.msra.mxu2 %v4352_v47  ;;  %v4358_v47 = vld [vmem:[#allocation51_spill] sm:$0xff] }
 0x1b1   :  { %1780 = vmatpush.msra.mxu3 %v4324_v56 }
 0x1b2   :  { %1719 = vmatpush.msra.mxu2 %v4353_v15  ;;  %v4360_v15 = vld [vmem:[#allocation58_spill] sm:$0xff] }
 0x1b3   :  { %1782 = vmatpush.msra.mxu3 %v4329_v17  ;;  %v4363_v17 = vld [vmem:[#allocation62_spill] sm:$0xff] }
 0x1b4   :  { %1723 = vmatpush.msra.mxu2 %v4354_v48 }
 0x1b5   :  { %1784 = vmatpush.msra.mxu3 %v4333_v7 }
 0x1b6   :  { %1727 = vmatpush.msra.mxu2 %v4355_v13 }
 0x1b7   :  { %1786 = vmatpush.msra.mxu3 %v4335_v51 }
 0x1b8   :  { %1731 = vmatpush.msra.mxu2 %v4356_v28 }
 0x1b9   :  { %1788 = vmatpush.msra.mxu3 %v4337_v55 }
 0x1ba   :  { %1735 = vmatpush.msra.mxu2 %v4357_v53 }
 0x1bc   :  { %1739 = vmatpush.msra.mxu2 %v4358_v47 }
 0x1be   :  { %1743 = vmatpush.msra.mxu2 %v4359_v31 }
 0x1c0   :  { %1747 = vmatpush.msra.mxu2 %v4360_v15 }
 0x1e3   :  { %v1009_v35 = vpop.f32.mrf.mxu1 }
 0x1eb   :  { %v900_v48 = vpop.f32.mrf.mxu0  ;;  %v1067_v36 = vpop.f32.mrf.mxu2 }
 0x1ec   :  { %v1010_v19 = vadd.f32 %v1009_v35, %v900_v48  ;;  %v1013_v57 = vpop.f32.mrf.mxu1  ;;  %v1799_v35 = vmul.f32 %v4362_v44, %v4362_v44 }
 0x1ed   :  { %v1111_v13 = vpop.f32.mrf.mxu3 }
 0x1ee   :  { %v1068_v14 = vadd.f32 %v1067_v36, %v1010_v19  ;;  %v1814_v29 = vand.u32 4294901760, %v1799_v35  ;;  %v1798_v19 = vmul.f32 %v4363_v17, %v4363_v17 }
 0x1f0   :  { %v1112_v22 = vadd.f32 %v1111_v13, %v1068_v14  ;;  %1815 = vmatpush.msra.mxu0 %v1814_v29  ;;  %v1816_v36 = vand.u32 4294901760, %v1798_v19 }
 0x1f2   :  { %1817 = vmatpush.msra.mxu0 %v1816_v36 }
 0x1f3   :  { %v908_v32 = vpop.f32.mrf.mxu0  ;;  %v1072_v51 = vpop.f32.mrf.mxu2 }
 0x1f4   :  { %v1014_v28 = vadd.f32 %v1013_v57, %v908_v32  ;;  %v1227_v59 = vpop.f32.mrf.mxu1 }
 0x1f5   :  { %v1117_v53 = vpop.f32.mrf.mxu3 }
 0x1f6   :  { %v1073_v55 = vadd.f32 %v1072_v51, %v1014_v28  ;;  %v1850_v51 = vsub.f32 %v1799_v35, %v1814_v29 }
 0x1f8   :  { %v1118_v43 = vadd.f32 %v1117_v53, %v1073_v55  ;;  %v1851_v13 = vand.u32 4294901760, %v1850_v51 }
 0x1fa   :  { %v1852_v17 = vsub.f32 %v1850_v51, %v1851_v13 }
 0x1fb   :  { %v1186_v47 = vpop.f32.mrf.mxu0  ;;  %v1268_v15 = vpop.f32.mrf.mxu2 }
 0x1fc   :  { %v1187_v7 = vadd.f32 %v1186_v47, %v1112_v22  ;;  %v1231_v48 = vpop.f32.mrf.mxu1  ;;  %v1853_v35 = vand.u32 4294901760, %v1852_v17 }
 0x1fd   :  { %v1303_v14 = vpop.f32.mrf.mxu3 }
 0x1fe   :  { %v3824_v31 = vadd.f32 %v1227_v59, %v1187_v7  ;;  %v1856_v7 = vsub.f32 %v1798_v19, %v1816_v36  ;;  %v3832_v59 = vmul.f32 %v3702_v40, %v3702_v40  ;;  %1854 = vmatpush.msra.mxu1 %v1853_v35  ;;  %v1304_v18 = vadd.f32 %v1303_v14, %v1268_v15  ;;  %v4369_v15 = vld [vmem:[#allocation17_spill] sm:$0xff]  ;;  %v4370_v14 = vld [vmem:[#allocation44_spill] sm:$0xff] }
 0x200   :  { %4361 = vst [vmem:[#allocation19_spill] sm:$0xff] %v3824_v31 }
 0x201   :  { %4364 = vst [vmem:[#allocation20_spill] sm:$0xff] %v3832_v59 }
 0x203   :  { %v1190_v32 = vpop.f32.mrf.mxu0  ;;  %v1329_v47 = vpop.f32.mrf.mxu2 }
 0x204   :  { %v1191_v57 = vadd.f32 %v1190_v32, %v1118_v43  ;;  %v1299_v28 = vpop.f32.mrf.mxu1  ;;  %v1857_v43 = vand.u32 4294901760, %v1856_v7 }
 0x206   :  { %v1232_v55 = vadd.f32 %v1231_v48, %v1191_v57  ;;  %v1858_v19 = vsub.f32 %v1856_v7, %v1857_v43  ;;  %v1359_v57 = vpop.f32.mrf.mxu3 }
 0x208   :  { %v3834_v44 = vmul.f32 %v1232_v55, %v1232_v55  ;;  %v3837_v22 = vmul.f32 %v1232_v55, %v3702_v40  ;;  %v1859_v31 = vand.u32 4294901760, %v1858_v19  ;;  %v4381_v19 = vld [vmem:[#allocation50_spill] sm:$0xff] }
 0x20a   :  { %4365 = vst [vmem:[#allocation25_spill] sm:$0xff] %v3834_v44  ;;  %v3841_v53 = vadd.f32 %v3834_v44, %v3832_v59  ;;  %1860 = vmatpush.msra.mxu1 %v1859_v31 }
 0x20b   :  { %4366 = vst [vmem:[#allocation26_spill] sm:$0xff] %v3837_v22  ;;  %v1260_v48 = vpop.f32.mrf.mxu0  ;;  %v1334_v55 = vpop.f32.mrf.mxu2 }
 0x20c   :  { %4367 = vst [vmem:[#allocation61_spill] sm:$0xff] %v3841_v53  ;;  %v1300_v32 = vadd.f32 %v1299_v28, %v1260_v48  ;;  %v1419_v63 = vpop.f32.mrf.mxu1  ;;  %v1335_v1 = vadd.f32 %v1334_v55, %v1304_v18  ;;  %v4385_v55 = vld [vmem:[#allocation40_spill] sm:$0xff] }
 0x20e   :  { %v1330_v16 = vadd.f32 %v1329_v47, %v1300_v32  ;;  %v1365_v45 = vpop.f32.mrf.mxu3  ;;  %v4378_v47 = vld [vmem:[#allocation47_spill] sm:$0xff]  ;;  %v4382_v32 = vld [vmem:[#allocation60_spill] sm:$0xff] }
 0x20f   :  { %v1366_v53 = vadd.f32 %v1365_v45, %v1335_v1 }
 0x210   :  { %v1360_v40 = vadd.f32 %v1359_v57, %v1330_v16  ;;  %v4383_v57 = vld [vmem:[#allocation38_spill] sm:$0xff] }
 0x213   :  { %v1392_v22 = vpop.f32.mrf.mxu0 }
 0x214   :  { %v1393_v56 = vadd.f32 %v1392_v22, %v1360_v40  ;;  %v1423_v28 = vpop.f32.mrf.mxu1  ;;  %v4377_v22 = vld [vmem:[#allocation57_spill] sm:$0xff] }
 0x215   :  { %v4384_v40 = vld [vmem:[#allocation53_spill] sm:$0xff] }
 0x216   :  { %v1420_v0 = vadd.f32 %v1419_v63, %v1393_v56 }
 0x218   :  { %v1458_v44 = vand.u32 4294901760, %v1420_v0 }
 0x21a   :  { %v1459_v17 = vsub.f32 %v1420_v0, %v1458_v44  ;;  %1572 = vmatmul.f32.vlgmr.msrb.gmra.mxu3 %v1458_v44 }
 0x21b   :  { %v1396_v59 = vpop.f32.mrf.mxu0  ;;  %1978 = vmatpush.msrb.mxu3 %v1814_v29 }
 0x21c   :  { %v1460_v35 = vand.u32 4294901760, %v1459_v17  ;;  %v1397_v48 = vadd.f32 %v1396_v59, %v1366_v53  ;;  %1630 = vmatmul.f32.vlgmr.msrb.gmra.mxu0 %v1459_v17  ;;  %v4375_v59 = vld [vmem:[#allocation45_spill] sm:$0xff]  ;;  %v4380_v53 = vld [vmem:[#allocation35_spill] sm:$0xff] }
 0x21d   :  { %1886 = vmatpush.msrb.mxu0 %v1850_v51  ;;  %1980 = vmatpush.msrb.mxu3 %v1816_v36  ;;  %v4371_v51 = vld [vmem:[#allocation36_spill] sm:$0xff] }
 0x21e   :  { %v1461_v16 = vsub.f32 %v1459_v17, %v1460_v35  ;;  %v1424_v31 = vadd.f32 %v1423_v28, %v1397_v48  ;;  %1674 = vmatmul.f32.vlgmr.msrb.gmra.mxu1 %v1460_v35  ;;  %v4386_v17 = vld [vmem:[#allocation21_spill] sm:$0xff]  ;;  %v4387_v28 = vld [vmem:[#allocation46_spill] sm:$0xff] }
 0x21f   :  { %1916 = vmatpush.msrb.mxu1 %v1814_v29  ;;  %1889 = vmatpush.msrb.mxu0 %v1856_v7  ;;  %v4368_v29 = vld [vmem:[#allocation29_spill] sm:$0xff]  ;;  %v4374_v7 = vld [vmem:[#allocation54_spill] sm:$0xff] }
 0x220   :  { %v1466_v18 = vand.u32 4294901760, %v1424_v31  ;;  %v1462_v56 = vand.u32 4294901760, %v1461_v16  ;;  %v4388_v35 = vld [vmem:[#allocation22_spill] sm:$0xff]  ;;  %v4389_v48 = vld [vmem:[#allocation49_spill] sm:$0xff]  ;;  %v4390_v16 = vld [vmem:[#allocation23_spill] sm:$0xff] }
 0x221   :  { %1918 = vmatpush.msrb.mxu1 %v1816_v36  ;;  %v4372_v36 = vld [vmem:[#allocation18_spill] sm:$0xff] }
 0x222   :  { %v1467_v63 = vsub.f32 %v1424_v31, %v1466_v18  ;;  %1463 = vmatmul.f32.vlgmr.msrb.gmra.mxu2 %v1462_v56  ;;  %1576 = vmatmul.f32.gmra.mxu3 %v1466_v18  ;;  %v4391_v31 = vld [vmem:[#allocation52_spill] sm:$0xff] }
 0x223   :  { %1949 = vmatpush.msrb.mxu2 %v1851_v13  ;;  %v4373_v13 = vld [vmem:[#allocation30_spill] sm:$0xff]  ;;  %v4393_v56 = vld [vmem:[#allocation56_spill] sm:$0xff] }
 0x224   :  { %1635 = vmatmul.f32.gmra.mxu0 %v1467_v63  ;;  %v1468_v0 = vand.u32 4294901760, %v1467_v63 }
 0x225   :  { %1953 = vmatpush.msrb.mxu2 %v1857_v43  ;;  %v4379_v43 = vld [vmem:[#allocation59_spill] sm:$0xff] }
 0x226   :  { %1680 = vmatmul.f32.gmra.mxu1 %v1468_v0  ;;  %v1469_v1 = vsub.f32 %v1467_v63, %v1468_v0  ;;  %v4394_v63 = vld [vmem:[#allocation27_spill] sm:$0xff]  ;;  %v4395_v0 = vld [vmem:[#allocation28_spill] sm:$0xff] }
 0x228   :  { %v1470_v45 = vand.u32 4294901760, %v1469_v1  ;;  %v4396_v1 = vld [vmem:[#allocation31_spill] sm:$0xff] }
 0x22a   :  { %1471 = vmatmul.f32.gmra.mxu2 %v1470_v45  ;;  %1790 = vmatmul.f32.vlgmr.msra.gmra.mxu3 %v1458_v44  ;;  %v4397_v45 = vld [vmem:[#allocation33_spill] sm:$0xff] }
 0x22b   :  { %2204 = vmatpush.msra.mxu3 %v3241_v24 }
 0x22c   :  { %1823 = vmatmul.f32.vlgmr.msra.gmra.mxu0 %v3265_v39 }
 0x22d   :  { %1991 = vmatpush.msra.mxu0 %v3241_v24  ;;  %2206 = vmatpush.msra.mxu3 %v3243_v25 }
 0x22e   :  { %1862 = vmatmul.f32.vlgmr.msra.gmra.mxu1 %v3222_v10 }
 0x22f   :  { %2044 = vmatpush.msra.mxu1 %v3318_v61  ;;  %1993 = vmatpush.msra.mxu0 %v3243_v25 }
 0x230   :  { %2208 = vmatpush.msra.mxu3 %v3245_v26 }
 0x231   :  { %2050 = vmatpush.msra.mxu1 %v3320_v62  ;;  %1995 = vmatpush.msra.mxu0 %v3245_v26 }
 0x232   :  { %1749 = vmatmul.f32.vlgmr.msra.gmra.mxu2 %v1458_v44  ;;  %1794 = vmatmul.f32.gmra.mxu3 %v1466_v18  ;;  %v4376_v44 = vld [vmem:[#allocation34_spill] sm:$0xff] }
 0x233   :  { %2056 = vmatpush.msra.mxu1 %v3330_v3  ;;  %1997 = vmatpush.msra.mxu0 %v3247_v27 }
 0x234   :  { %1831 = vmatmul.f32.gmra.mxu0 %v3326_v2  ;;  %2146 = vmatpush.msra.mxu2 %v3253_v33 }
 0x235   :  { %2062 = vmatpush.msra.mxu1 %v3345_v4  ;;  %1999 = vmatpush.msra.mxu0 %v3269_v41 }
 0x236   :  { %1866 = vmatmul.f32.gmra.mxu1 %v3224_v11  ;;  %2149 = vmatpush.msra.mxu2 %v3256_v34 }
 0x237   :  { %2068 = vmatpush.msra.mxu1 %v3368_v21  ;;  %2001 = vmatpush.msra.mxu0 %v3271_v42 }
 0x238   :  { %2152 = vmatpush.msra.mxu2 %v4322_v5  ;;  %2210 = vmatpush.msra.mxu3 %v3247_v27 }
 0x239   :  { %2074 = vmatpush.msra.mxu1 %v3381_v30  ;;  %2003 = vmatpush.msra.mxu0 %v3293_v49 }
 0x23a   :  { %1753 = vmatmul.f32.gmra.mxu2 %v1466_v18  ;;  %1982 = vmatmul.f32.vlgmr.msrb.gmra.mxu3 %v3222_v10  ;;  %v4392_v18 = vld [vmem:[#allocation24_spill] sm:$0xff] }
 0x23b   :  { %2080 = vmatpush.msra.mxu1 %v3395_v38  ;;  %2005 = vmatpush.msra.mxu0 %v3295_v50 }
 0x23c   :  { %1892 = vmatmul.f32.vlgmr.msrb.gmra.mxu0 %v3227_v12  ;;  %2155 = vmatpush.msra.mxu2 %v4325_v46 }
 0x23d   :  { %2086 = vmatpush.msra.mxu1 %v3406_v52  ;;  %2007 = vmatpush.msra.mxu0 %v3339_v8 }
 0x23e   :  { %1922 = vmatmul.f32.vlgmr.msrb.gmra.mxu1 %v3235_v20  ;;  %2158 = vmatpush.msra.mxu2 %v4327_v37 }
 0x23f   :  { %2092 = vmatpush.msra.mxu1 %v3418_v58  ;;  %2009 = vmatpush.msra.mxu0 %v3341_v9 }
 0x240   :  { %2161 = vmatpush.msra.mxu2 %v4330_v54  ;;  %2212 = vmatpush.msra.mxu3 %v3269_v41 }
 0x241   :  { %2098 = vmatpush.msra.mxu1 %v3425_v60  ;;  %2011 = vmatpush.msra.mxu0 %v4321_v23 }
 0x242   :  { %1955 = vmatmul.f32.vlgmr.msrb.gmra.mxu2 %v3222_v10  ;;  %1986 = vmatmul.f32.gmra.mxu3 %v3224_v11 }
 0x243   :  { %2104 = vmatpush.msra.mxu1 %v3433_v6  ;;  %2164 = vmatpush.msra.mxu2 %v4368_v29 }
 0x244   :  { %1897 = vmatmul.f32.gmra.mxu0 %v4369_v15  ;;  %2214 = vmatpush.msra.mxu3 %v3271_v42 }
 0x245   :  { %2110 = vmatpush.msra.mxu1 %v4370_v14  ;;  %2013 = vmatpush.msra.mxu0 %v4371_v51 }
 0x246   :  { %1928 = vmatmul.f32.gmra.mxu1 %v4372_v36  ;;  %2167 = vmatpush.msra.mxu2 %v4373_v13  ;;  %v3033_v13 = vld [vmem:[#allocation5] sm:$0xff] }
 0x247   :  { %2116 = vmatpush.msra.mxu1 %v4374_v7  ;;  %2216 = vmatpush.msra.mxu3 %v3293_v49  ;;  %v3032_v7 = vld [vmem:[#allocation2] sm:$0xff] }
 0x248   :  { %2015 = vmatpush.msra.mxu0 %v4375_v59  ;;  %2170 = vmatpush.msra.mxu2 %v4376_v44 }
 0x249   :  { %2122 = vmatpush.msra.mxu1 %v4377_v22  ;;  %2218 = vmatpush.msra.mxu3 %v3295_v50 }
 0x24a   :  { %1959 = vmatmul.f32.gmra.mxu2 %v3224_v11  ;;  %2017 = vmatpush.msra.mxu0 %v4378_v47 }
 0x24b   :  { %2128 = vmatpush.msra.mxu1 %v4379_v43  ;;  %2173 = vmatpush.msra.mxu2 %v4380_v53  ;;  %v3031_v43 = vld [vmem:[#allocation5 + $0x8] sm:$0xff] }
 0x24c   :  { %2220 = vmatpush.msra.mxu3 %v3339_v8  ;;  %2019 = vmatpush.msra.mxu0 %v4381_v19 }
 0x24d   :  { %2134 = vmatpush.msra.mxu1 %v4382_v32  ;;  %2176 = vmatpush.msra.mxu2 %v4383_v57 }
 0x24e   :  { %2222 = vmatpush.msra.mxu3 %v3341_v9  ;;  %2021 = vmatpush.msra.mxu0 %v4384_v40 }
 0x24f   :  { %2322 = vmatpush.msrb.mxu1 %v3241_v24  ;;  %2179 = vmatpush.msra.mxu2 %v4385_v55 }
 0x250   :  { %2224 = vmatpush.msra.mxu3 %v4321_v23  ;;  %2251 = vmatpush.msrb.mxu0 %v4386_v17 }
 0x251   :  { %2324 = vmatpush.msrb.mxu1 %v3243_v25  ;;  %2182 = vmatpush.msra.mxu2 %v4387_v28 }
 0x252   :  { %2226 = vmatpush.msra.mxu3 %v4371_v51  ;;  %2255 = vmatpush.msrb.mxu0 %v4388_v35 }
 0x253   :  { %2326 = vmatpush.msrb.mxu1 %v3245_v26  ;;  %2185 = vmatpush.msra.mxu2 %v4389_v48 }
 0x254   :  { %2228 = vmatpush.msra.mxu3 %v4375_v59  ;;  %2259 = vmatpush.msrb.mxu0 %v4390_v16 }
 0x255   :  { %2328 = vmatpush.msrb.mxu1 %v3247_v27  ;;  %2188 = vmatpush.msra.mxu2 %v4391_v31 }
 0x256   :  { %2230 = vmatpush.msra.mxu3 %v4378_v47  ;;  %2263 = vmatpush.msrb.mxu0 %v4392_v18  ;;  %v4400_v18 = vld [vmem:[#allocation41_spill] sm:$0xff] }
 0x257   :  { %2330 = vmatpush.msrb.mxu1 %v3269_v41  ;;  %2191 = vmatpush.msra.mxu2 %v4393_v56  ;;  %v4398_v56 = vld [vmem:[#allocation37_spill] sm:$0xff] }
 0x258   :  { %2232 = vmatpush.msra.mxu3 %v4381_v19  ;;  %2267 = vmatpush.msrb.mxu0 %v4394_v63  ;;  %v4399_v63 = vld [vmem:[#allocation39_spill] sm:$0xff] }
 0x259   :  { %2332 = vmatpush.msrb.mxu1 %v3271_v42 }
 0x25a   :  { %2234 = vmatpush.msra.mxu3 %v4384_v40  ;;  %2271 = vmatpush.msrb.mxu0 %v4395_v0  ;;  %v4401_v0 = vld [vmem:[#allocation42_spill] sm:$0xff] }
 0x25b   :  { %2334 = vmatpush.msrb.mxu1 %v3293_v49 }
 0x25c   :  { %2275 = vmatpush.msrb.mxu0 %v4396_v1  ;;  %v4402_v1 = vld [vmem:[#allocation48_spill] sm:$0xff] }
 0x25d   :  { %2336 = vmatpush.msrb.mxu1 %v3295_v50 }
 0x25e   :  { %2279 = vmatpush.msrb.mxu0 %v4397_v45  ;;  %v4403_v45 = vld [vmem:[#allocation51_spill] sm:$0xff] }
 0x25f   :  { %2338 = vmatpush.msrb.mxu1 %v3339_v8 }
 0x260   :  { %2283 = vmatpush.msrb.mxu0 %v4398_v56  ;;  %v4404_v56 = vld [vmem:[#allocation55_spill] sm:$0xff] }
 0x261   :  { %2340 = vmatpush.msrb.mxu1 %v3341_v9 }
 0x262   :  { %2287 = vmatpush.msrb.mxu0 %v4399_v63  ;;  %v4405_v63 = vld [vmem:[#allocation58_spill] sm:$0xff] }
 0x263   :  { %2342 = vmatpush.msrb.mxu1 %v4321_v23 }
 0x264   :  { %2291 = vmatpush.msrb.mxu0 %v4400_v18 }
 0x265   :  { %2344 = vmatpush.msrb.mxu1 %v4371_v51 }
 0x266   :  { %2295 = vmatpush.msrb.mxu0 %v4401_v0 }
 0x267   :  { %2346 = vmatpush.msrb.mxu1 %v4375_v59 }
 0x268   :  { %2299 = vmatpush.msrb.mxu0 %v4402_v1 }
 0x269   :  { %2348 = vmatpush.msrb.mxu1 %v4378_v47 }
 0x26a   :  { %2303 = vmatpush.msrb.mxu0 %v4403_v45 }
 0x26b   :  { %2350 = vmatpush.msrb.mxu1 %v4381_v19 }
 0x26c   :  { %2307 = vmatpush.msrb.mxu0 %v4404_v56 }
 0x26d   :  { %2352 = vmatpush.msrb.mxu1 %v4384_v40  ;;  %v3030_v40 = vld [vmem:[#allocation2 + $0x8] sm:$0xff] }
 0x26e   :  { %2311 = vmatpush.msrb.mxu0 %v4405_v63  ;;  %v2363_v56 = vmul.f32 %v3031_v43, %v3030_v40 }
 0x270   :  { %v2378_v44 = vand.u32 4294901760, %v2363_v56 }
 0x272   :  { %2379 = vmatpush.msrb.mxu2 %v2378_v44  ;;  %v2414_v59 = vsub.f32 %v2363_v56, %v2378_v44 }
 0x299   :  { %v1631_v31 = vpop.f32.mrf.mxu0 }
 0x29b   :  { %v1675_v18 = vpop.f32.mrf.mxu1 }
 0x29d   :  { %v1573_v16 = vpop.f32.mrf.mxu3 }
 0x2a1   :  { %v1636_v48 = vpop.f32.mrf.mxu0 }
 0x2a3   :  { %v1681_v35 = vpop.f32.mrf.mxu1 }
 0x2a5   :  { %v1464_v0 = vpop.f32.mrf.mxu2  ;;  %v1577_v17 = vpop.f32.mrf.mxu3 }
 0x2a6   :  { %v1574_v28 = vadd.f32 %v1573_v16, %v1464_v0  ;;  %v2362_v16 = vmul.f32 %v3033_v13, %v3032_v7 }
 0x2a8   :  { %v1632_v55 = vadd.f32 %v1631_v31, %v1574_v28 }
 0x2a9   :  { %v1824_v1 = vpop.f32.mrf.mxu0 }
 0x2aa   :  { %v1676_v57 = vadd.f32 %v1675_v18, %v1632_v55  ;;  %v2415_v55 = vand.u32 4294901760, %v2414_v59  ;;  %v2380_v18 = vand.u32 4294901760, %v2362_v16 }
 0x2ab   :  { %v1863_v32 = vpop.f32.mrf.mxu1 }
 0x2ac   :  { %2381 = vmatpush.msrb.mxu2 %v2380_v18 }
 0x2ad   :  { %v1472_v19 = vpop.f32.mrf.mxu2  ;;  %v1791_v47 = vpop.f32.mrf.mxu3 }
 0x2ae   :  { %v1578_v45 = vadd.f32 %v1577_v17, %v1472_v19  ;;  %v2416_v19 = vsub.f32 %v2414_v59, %v2415_v55  ;;  %v2420_v17 = vsub.f32 %v2362_v16, %v2380_v18 }
 0x2b0   :  { %v1637_v53 = vadd.f32 %v1636_v48, %v1578_v45  ;;  %v2417_v43 = vand.u32 4294901760, %v2416_v19  ;;  %v2421_v40 = vand.u32 4294901760, %v2420_v17  ;;  %v1864_v45 = vadd.f32 %v1863_v32, %v1824_v1 }
 0x2b1   :  { %v1832_v63 = vpop.f32.mrf.mxu0 }
 0x2b2   :  { %v1682_v22 = vadd.f32 %v1681_v35, %v1637_v53  ;;  %2418 = vmatpush.msrb.mxu3 %v2417_v43  ;;  %v2422_v35 = vsub.f32 %v2420_v17, %v2421_v40 }
 0x2b3   :  { %v1867_v0 = vpop.f32.mrf.mxu1 }
 0x2b4   :  { %v2423_v13 = vand.u32 4294901760, %v2422_v35  ;;  %v1868_v15 = vadd.f32 %v1867_v0, %v1832_v63  ;;  %v4434_v0 = vld [vmem:[#allocation24_spill] sm:$0xff] }
 0x2b5   :  { %v1750_v28 = vpop.f32.mrf.mxu2  ;;  %v1795_v48 = vpop.f32.mrf.mxu3 }
 0x2b6   :  { %v1751_v31 = vadd.f32 %v1750_v28, %v1676_v57  ;;  %2424 = vmatpush.msrb.mxu3 %v2423_v13 }
 0x2b8   :  { %v3951_v36 = vadd.f32 %v1791_v47, %v1751_v31  ;;  %v4407_v47 = vld [vmem:[#allocation20_spill] sm:$0xff] }
 0x2b9   :  { %v1893_v53 = vpop.f32.mrf.mxu0 }
 0x2ba   :  { %4406 = vst [vmem:[#allocation62_spill] sm:$0xff] %v3951_v36  ;;  %v1894_v14 = vadd.f32 %v1893_v53, %v1864_v45  ;;  %v4447_v45 = vld [vmem:[#allocation58_spill] sm:$0xff] }
 0x2bb   :  { %v1923_v7 = vpop.f32.mrf.mxu1 }
 0x2bc   :  { %v1924_v16 = vadd.f32 %v1923_v7, %v1894_v14 }
 0x2bd   :  { %v1754_v56 = vpop.f32.mrf.mxu2  ;;  %v1983_v31 = vpop.f32.mrf.mxu3 }
 0x2be   :  { %v1755_v51 = vadd.f32 %v1754_v56, %v1682_v22 }
 0x2c0   :  { %v3953_v57 = vadd.f32 %v1795_v48, %v1755_v51 }
 0x2c1   :  { %v1898_v19 = vpop.f32.mrf.mxu0 }
 0x2c2   :  { %v2933_v28 = vsub.f32 %v3953_v57, %v4407_v47  ;;  %v1899_v43 = vadd.f32 %v1898_v19, %v1868_v15 }
 0x2c3   :  { %v1929_v23 = vpop.f32.mrf.mxu1 }
 0x2c4   :  { %v1930_v22 = vadd.f32 %v1929_v23, %v1899_v43 }
 0x2c5   :  { %v1956_v36 = vpop.f32.mrf.mxu2  ;;  %v1987_v51 = vpop.f32.mrf.mxu3 }
 0x2c6   :  { %v1957_v29 = vadd.f32 %v1956_v36, %v1924_v16  ;;  %v4449_v16 = vld [vmem:[#allocation65_spill] sm:$0xff] }
 0x2c8   :  { %v1984_v6 = vadd.f32 %v1983_v31, %v1957_v29  ;;  %v4448_v31 = vld [vmem:[#allocation66_spill] sm:$0xff] }
 0x2c9   :  { %v448_v19 = vadd.f32 %v4449_v16, %v4448_v31 }
 0x2ca   :  { %v2022_v32 = vand.u32 4294901760, %v1984_v6 }
 0x2cc   :  { %v2023_v1 = vsub.f32 %v1984_v6, %v2022_v32  ;;  %2136 = vmatmul.f32.vlgmr.msra.gmra.mxu1 %v2022_v32 }
 0x2cd   :  { %v1960_v53 = vpop.f32.mrf.mxu2  ;;  %2542 = vmatpush.msra.mxu1 %v2378_v44 }
 0x2ce   :  { %v2024_v48 = vand.u32 4294901760, %v2023_v1  ;;  %v1961_v35 = vadd.f32 %v1960_v53, %v1930_v22  ;;  %2194 = vmatmul.f32.vlgmr.msra.gmra.mxu2 %v2023_v1  ;;  %v4450_v53 = vld [vmem:[#allocation63_spill] sm:$0xff] }
 0x2cf   :  { %2450 = vmatpush.msra.mxu2 %v2414_v59  ;;  %2544 = vmatpush.msra.mxu1 %v2380_v18  ;;  %v4430_v59 = vld [vmem:[#allocation22_spill] sm:$0xff] }
 0x2d0   :  { %v2025_v14 = vsub.f32 %v2023_v1, %v2024_v48  ;;  %v1988_v56 = vadd.f32 %v1987_v51, %v1961_v35  ;;  %2238 = vmatmul.f32.vlgmr.msra.gmra.mxu3 %v2024_v48  ;;  %v506_v51 = vadd.f32 %v4450_v53, %v448_v19 }
 0x2d1   :  { %2480 = vmatpush.msra.mxu3 %v2378_v44  ;;  %2453 = vmatpush.msra.mxu2 %v2420_v17  ;;  %v4432_v44 = vld [vmem:[#allocation23_spill] sm:$0xff] }
 0x2d2   :  { %v2030_v15 = vand.u32 4294901760, %v1988_v56  ;;  %v2026_v29 = vand.u32 4294901760, %v2025_v14  ;;  %v4441_v17 = vld [vmem:[#allocation39_spill] sm:$0xff] }
 0x2d3   :  { %2482 = vmatpush.msra.mxu3 %v2380_v18  ;;  %v4439_v18 = vld [vmem:[#allocation33_spill] sm:$0xff] }
 0x2d4   :  { %v2031_v36 = vsub.f32 %v1988_v56, %v2030_v15  ;;  %2027 = vmatmul.f32.vlgmr.msra.gmra.mxu0 %v2026_v29  ;;  %2140 = vmatmul.f32.gmra.mxu1 %v2030_v15  ;;  %v4451_v56 = vld [vmem:[#allocation64_spill] sm:$0xff] }
 0x2d5   :  { %2513 = vmatpush.msra.mxu0 %v2415_v55  ;;  %v4436_v55 = vld [vmem:[#allocation27_spill] sm:$0xff] }
 0x2d6   :  { %2199 = vmatmul.f32.gmra.mxu2 %v2031_v36  ;;  %v2032_v6 = vand.u32 4294901760, %v2031_v36 }
 0x2d7   :  { %2517 = vmatpush.msra.mxu0 %v2421_v40  ;;  %v4446_v40 = vld [vmem:[#allocation55_spill] sm:$0xff] }
 0x2d8   :  { %v2033_v23 = vsub.f32 %v2031_v36, %v2032_v6  ;;  %2244 = vmatmul.f32.gmra.mxu3 %v2032_v6 }
 0x2da   :  { %v2034_v63 = vand.u32 4294901760, %v2033_v23  ;;  %v4452_v23 = vld [vmem:[#allocation16_spill] sm:$0xff] }
 0x2dc   :  { %2035 = vmatmul.f32.gmra.mxu0 %v2034_v63  ;;  %2354 = vmatmul.f32.vlgmr.msrb.gmra.mxu1 %v2022_v32 }
 0x2dd   :  { %2768 = vmatpush.msrb.mxu1 %v3241_v24 }
 0x2de   :  { %2387 = vmatmul.f32.vlgmr.msrb.gmra.mxu2 %v3265_v39  ;;  %v4412_v39 = vld [vmem:[#allocation44_spill] sm:$0xff] }
 0x2df   :  { %2555 = vmatpush.msrb.mxu2 %v3241_v24  ;;  %2770 = vmatpush.msrb.mxu1 %v3243_v25 }
 0x2e0   :  { %2426 = vmatmul.f32.vlgmr.msrb.gmra.mxu3 %v3222_v10 }
 0x2e1   :  { %2608 = vmatpush.msrb.mxu3 %v3318_v61  ;;  %2557 = vmatpush.msrb.mxu2 %v3243_v25  ;;  %v4413_v61 = vld [vmem:[#allocation36_spill] sm:$0xff] }
 0x2e2   :  { %2772 = vmatpush.msrb.mxu1 %v3245_v26 }
 0x2e3   :  { %2614 = vmatpush.msrb.mxu3 %v3320_v62  ;;  %2559 = vmatpush.msrb.mxu2 %v3245_v26  ;;  %v4414_v62 = vld [vmem:[#allocation18_spill] sm:$0xff] }
 0x2e4   :  { %2313 = vmatmul.f32.vlgmr.msrb.gmra.mxu0 %v2022_v32  ;;  %2358 = vmatmul.f32.gmra.mxu1 %v2030_v15 }
 0x2e5   :  { %2620 = vmatpush.msrb.mxu3 %v3330_v3  ;;  %2561 = vmatpush.msrb.mxu2 %v3247_v27  ;;  %v4416_v3 = vld [vmem:[#allocation54_spill] sm:$0xff] }
 0x2e6   :  { %2395 = vmatmul.f32.gmra.mxu2 %v3326_v2  ;;  %2710 = vmatpush.msrb.mxu0 %v3253_v33  ;;  %v4409_v33 = vld [vmem:[#allocation43_spill] sm:$0xff]  ;;  %v4415_v2 = vld [vmem:[#allocation30_spill] sm:$0xff] }
 0x2e7   :  { %2626 = vmatpush.msrb.mxu3 %v3345_v4  ;;  %2563 = vmatpush.msrb.mxu2 %v3269_v41  ;;  %v4418_v4 = vld [vmem:[#allocation34_spill] sm:$0xff] }
 0x2e8   :  { %2430 = vmatmul.f32.gmra.mxu3 %v3224_v11  ;;  %2713 = vmatpush.msrb.mxu0 %v3256_v34  ;;  %v4411_v34 = vld [vmem:[#allocation17_spill] sm:$0xff] }
 0x2e9   :  { %2632 = vmatpush.msrb.mxu3 %v3368_v21  ;;  %2565 = vmatpush.msrb.mxu2 %v3271_v42  ;;  %v4419_v21 = vld [vmem:[#allocation57_spill] sm:$0xff] }
 0x2ea   :  { %2716 = vmatpush.msrb.mxu0 %v4322_v5  ;;  %2774 = vmatpush.msrb.mxu1 %v3247_v27  ;;  %v4425_v5 = vld [vmem:[#allocation38_spill] sm:$0xff] }
 0x2eb   :  { %2638 = vmatpush.msrb.mxu3 %v3381_v30  ;;  %2567 = vmatpush.msrb.mxu2 %v3293_v49  ;;  %v4420_v30 = vld [vmem:[#allocation47_spill] sm:$0xff] }
 0x2ec   :  { %2317 = vmatmul.f32.gmra.mxu0 %v2030_v15  ;;  %2546 = vmatmul.f32.vlgmr.msra.gmra.mxu1 %v3222_v10  ;;  %v550_v15 = vadd.f32 %v4451_v56, %v506_v51 }
 0x2ed   :  { %2644 = vmatpush.msrb.mxu3 %v3395_v38  ;;  %2569 = vmatpush.msrb.mxu2 %v3295_v50  ;;  %v4421_v38 = vld [vmem:[#allocation59_spill] sm:$0xff] }
 0x2ee   :  { %2456 = vmatmul.f32.vlgmr.msra.gmra.mxu2 %v3227_v12  ;;  %2719 = vmatpush.msrb.mxu0 %v4325_v46  ;;  %v4408_v12 = vld [vmem:[#allocation32_spill] sm:$0xff]  ;;  %v4426_v46 = vld [vmem:[#allocation53_spill] sm:$0xff]  ;;  %v625_v63 = vadd.f32 %v4452_v23, %v550_v15 }
 0x2ef   :  { %2650 = vmatpush.msrb.mxu3 %v3406_v52  ;;  %2571 = vmatpush.msrb.mxu2 %v3339_v8  ;;  %v4422_v52 = vld [vmem:[#allocation35_spill] sm:$0xff] }
 0x2f0   :  { %2486 = vmatmul.f32.vlgmr.msra.gmra.mxu3 %v3235_v20  ;;  %2722 = vmatpush.msrb.mxu0 %v4327_v37  ;;  %v4410_v20 = vld [vmem:[#allocation29_spill] sm:$0xff] }
 0x2f1   :  { %2656 = vmatpush.msrb.mxu3 %v3418_v58  ;;  %2573 = vmatpush.msrb.mxu2 %v3341_v9  ;;  %v4423_v58 = vld [vmem:[#allocation50_spill] sm:$0xff]  ;;  %v4428_v37 = vld [vmem:[#allocation21_spill] sm:$0xff] }
 0x2f2   :  { %2725 = vmatpush.msrb.mxu0 %v4330_v54  ;;  %2776 = vmatpush.msrb.mxu1 %v3269_v41  ;;  %v4429_v54 = vld [vmem:[#allocation46_spill] sm:$0xff] }
 0x2f3   :  { %2662 = vmatpush.msrb.mxu3 %v3425_v60  ;;  %2575 = vmatpush.msrb.mxu2 %v4408_v12  ;;  %v4424_v60 = vld [vmem:[#allocation60_spill] sm:$0xff] }
 0x2f4   :  { %2519 = vmatmul.f32.vlgmr.msra.gmra.mxu0 %v3222_v10  ;;  %2550 = vmatmul.f32.gmra.mxu1 %v3224_v11  ;;  %v4417_v10 = vld [vmem:[#allocation45_spill] sm:$0xff] }
 0x2f5   :  { %2668 = vmatpush.msrb.mxu3 %v4409_v33  ;;  %2728 = vmatpush.msrb.mxu0 %v4410_v20  ;;  %v4453_v20 = vld [vmem:[#allocation15_spill] sm:$0xff] }
 0x2f6   :  { %2461 = vmatmul.f32.gmra.mxu2 %v4411_v34  ;;  %2778 = vmatpush.msrb.mxu1 %v3271_v42  ;;  %v4071_v34 = vadd.f32 %v4453_v20, %v625_v63 }
 0x2f7   :  { %2674 = vmatpush.msrb.mxu3 %v4412_v39  ;;  %2577 = vmatpush.msrb.mxu2 %v4413_v61 }
 0x2f8   :  { %2492 = vmatmul.f32.gmra.mxu3 %v4414_v62  ;;  %2731 = vmatpush.msrb.mxu0 %v4415_v2  ;;  %v4454_v62 = vld [vmem:[#allocation19_spill] sm:$0xff] }
 0x2f9   :  { %2680 = vmatpush.msrb.mxu3 %v4416_v3  ;;  %2780 = vmatpush.msrb.mxu1 %v3293_v49  ;;  %v2928_v2 = vmul.f32 %v4454_v62, %v4454_v62 }
 0x2fa   :  { %2579 = vmatpush.msrb.mxu2 %v4417_v10  ;;  %2734 = vmatpush.msrb.mxu0 %v4418_v4 }
 0x2fb   :  { %2686 = vmatpush.msrb.mxu3 %v4419_v21  ;;  %2782 = vmatpush.msrb.mxu1 %v3295_v50  ;;  %v2926_v21 = vmul.f32 %v4071_v34, %v4071_v34 }
 0x2fc   :  { %2523 = vmatmul.f32.gmra.mxu0 %v3224_v11  ;;  %2581 = vmatpush.msrb.mxu2 %v4420_v30  ;;  %v4427_v11 = vld [vmem:[#allocation40_spill] sm:$0xff] }
 0x2fd   :  { %2692 = vmatpush.msrb.mxu3 %v4421_v38  ;;  %2737 = vmatpush.msrb.mxu0 %v4422_v52  ;;  %v2948_v38 = vadd.f32 %v2928_v2, %v2926_v21  ;;  %v4455_v52 = vld [vmem:[#allocation62_spill] sm:$0xff] }
 0x2fe   :  { %2784 = vmatpush.msrb.mxu1 %v3339_v8  ;;  %2583 = vmatpush.msrb.mxu2 %v4423_v58 }
 0x2ff   :  { %2698 = vmatpush.msrb.mxu3 %v4424_v60  ;;  %2740 = vmatpush.msrb.mxu0 %v4425_v5 }
 0x300   :  { %2786 = vmatpush.msrb.mxu1 %v3341_v9  ;;  %2585 = vmatpush.msrb.mxu2 %v4426_v46 }
 0x301   :  { %2886 = vmatpush.msra.mxu3 %v3241_v24  ;;  %2743 = vmatpush.msrb.mxu0 %v4427_v11  ;;  %v4431_v24 = vld [vmem:[#allocation49_spill] sm:$0xff]  ;;  %v2950_v11 = vadd.f32 0.0001, %v2948_v38 }
 0x302   :  { %2788 = vmatpush.msrb.mxu1 %v4408_v12  ;;  %2815 = vmatpush.msra.mxu2 %v4428_v37 }
 0x303   :  { %2888 = vmatpush.msra.mxu3 %v3243_v25  ;;  %2746 = vmatpush.msrb.mxu0 %v4429_v54  ;;  %v4433_v25 = vld [vmem:[#allocation52_spill] sm:$0xff] }
 0x304   :  { %2790 = vmatpush.msrb.mxu1 %v4413_v61  ;;  %2819 = vmatpush.msra.mxu2 %v4430_v59 }
 0x305   :  { %2890 = vmatpush.msra.mxu3 %v3245_v26  ;;  %2749 = vmatpush.msrb.mxu0 %v4431_v24  ;;  %v4435_v26 = vld [vmem:[#allocation56_spill] sm:$0xff] }
 0x306   :  { %2792 = vmatpush.msrb.mxu1 %v4417_v10  ;;  %2823 = vmatpush.msra.mxu2 %v4432_v44 }
 0x307   :  { %2892 = vmatpush.msra.mxu3 %v3247_v27  ;;  %2752 = vmatpush.msrb.mxu0 %v4433_v25  ;;  %v4437_v27 = vld [vmem:[#allocation28_spill] sm:$0xff] }
 0x308   :  { %2794 = vmatpush.msrb.mxu1 %v4420_v30  ;;  %2827 = vmatpush.msra.mxu2 %v4434_v0 }
 0x309   :  { %2894 = vmatpush.msra.mxu3 %v3269_v41  ;;  %2755 = vmatpush.msrb.mxu0 %v4435_v26  ;;  %v4438_v41 = vld [vmem:[#allocation31_spill] sm:$0xff]  ;;  %v4456_v26 = vld [vmem:[#allocation25_spill] sm:$0xff] }
 0x30a   :  { %2796 = vmatpush.msrb.mxu1 %v4423_v58  ;;  %2831 = vmatpush.msra.mxu2 %v4436_v55 }
 0x30b   :  { %2896 = vmatpush.msra.mxu3 %v3271_v42  ;;  %v4440_v42 = vld [vmem:[#allocation37_spill] sm:$0xff] }
 0x30c   :  { %2798 = vmatpush.msrb.mxu1 %v4426_v46  ;;  %2835 = vmatpush.msra.mxu2 %v4437_v27 }
 0x30d   :  { %2898 = vmatpush.msra.mxu3 %v3293_v49  ;;  %v4442_v49 = vld [vmem:[#allocation41_spill] sm:$0xff] }
 0x30e   :  { %2839 = vmatpush.msra.mxu2 %v4438_v41 }
 0x30f   :  { %2900 = vmatpush.msra.mxu3 %v3295_v50  ;;  %v4443_v50 = vld [vmem:[#allocation42_spill] sm:$0xff] }
 0x310   :  { %2843 = vmatpush.msra.mxu2 %v4439_v18  ;;  %v4457_v18 = vld [vmem:[#allocation61_spill] sm:$0xff] }
 0x311   :  { %2902 = vmatpush.msra.mxu3 %v3339_v8  ;;  %v4444_v8 = vld [vmem:[#allocation48_spill] sm:$0xff] }
 0x312   :  { %2847 = vmatpush.msra.mxu2 %v4440_v42  ;;  %v2951_v42 = vadd.f32 0.0001, %v4457_v18 }
 0x313   :  { %2904 = vmatpush.msra.mxu3 %v3341_v9  ;;  %v4445_v9 = vld [vmem:[#allocation51_spill] sm:$0xff] }
 0x314   :  { %2851 = vmatpush.msra.mxu2 %v4441_v17 }
 0x315   :  { %2906 = vmatpush.msra.mxu3 %v4408_v12 }
 0x316   :  { %2855 = vmatpush.msra.mxu2 %v4442_v49 }
 0x317   :  { %2908 = vmatpush.msra.mxu3 %v4413_v61 }
 0x318   :  { %2859 = vmatpush.msra.mxu2 %v4443_v50 }
 0x319   :  { %2910 = vmatpush.msra.mxu3 %v4417_v10 }
 0x31a   :  { %2863 = vmatpush.msra.mxu2 %v4444_v8 }
 0x31b   :  { %2912 = vmatpush.msra.mxu3 %v4420_v30 }
 0x31c   :  { %2867 = vmatpush.msra.mxu2 %v4445_v9 }
 0x31d   :  { %2914 = vmatpush.msra.mxu3 %v4423_v58  ;;  %v2932_v58 = vsub.f32 %v4455_v52, %v2926_v21  ;;  %v2930_v52 = vmul.f32 %v4454_v62, %v4071_v34 }
 0x31e   :  { %2871 = vmatpush.msra.mxu2 %v4446_v40 }
 0x31f   :  { %2916 = vmatpush.msra.mxu3 %v4426_v46 }
 0x320   :  { %2875 = vmatpush.msra.mxu2 %v4447_v45 }
 0x349   :  { %v2137_v13 = vpop.f32.mrf.mxu1 }
 0x351   :  { %v2028_v7 = vpop.f32.mrf.mxu0  ;;  %v2195_v32 = vpop.f32.mrf.mxu2 }
 0x352   :  { %v2138_v43 = vadd.f32 %v2137_v13, %v2028_v7  ;;  %v2141_v35 = vpop.f32.mrf.mxu1 }
 0x353   :  { %v2239_v22 = vpop.f32.mrf.mxu3 }
 0x354   :  { %v2196_v1 = vadd.f32 %v2195_v32, %v2138_v43 }
 0x356   :  { %v2240_v48 = vadd.f32 %v2239_v22, %v2196_v1 }
 0x359   :  { %v2036_v14 = vpop.f32.mrf.mxu0  ;;  %v2200_v36 = vpop.f32.mrf.mxu2 }
 0x35a   :  { %v2142_v29 = vadd.f32 %v2141_v35, %v2036_v14  ;;  %v2355_v39 = vpop.f32.mrf.mxu1 }
 0x35b   :  { %v2245_v6 = vpop.f32.mrf.mxu3 }
 0x35c   :  { %v2201_v12 = vadd.f32 %v2200_v36, %v2142_v29 }
 0x35e   :  { %v2246_v33 = vadd.f32 %v2245_v6, %v2201_v12 }
 0x361   :  { %v2314_v61 = vpop.f32.mrf.mxu0  ;;  %v2388_v10 = vpop.f32.mrf.mxu2 }
 0x362   :  { %v2315_v3 = vadd.f32 %v2314_v61, %v2240_v48  ;;  %v2359_v24 = vpop.f32.mrf.mxu1 }
 0x363   :  { %v2427_v4 = vpop.f32.mrf.mxu3 }
 0x364   :  { %v2356_v30 = vadd.f32 %v2355_v39, %v2315_v3  ;;  %v2428_v41 = vadd.f32 %v2427_v4, %v2388_v10 }
 0x366   :  { %v2934_v60 = vsub.f32 %v2356_v30, %v2928_v2 }
 0x368   :  { %v2952_v5 = vadd.f32 %v2934_v60, %v2932_v58 }
 0x369   :  { %v2318_v46 = vpop.f32.mrf.mxu0  ;;  %v2396_v59 = vpop.f32.mrf.mxu2 }
 0x36a   :  { %v2954_v37 = vadd.f32 0.0009, %v2952_v5  ;;  %v2319_v54 = vadd.f32 %v2318_v46, %v2246_v33  ;;  %v2547_v45 = vpop.f32.mrf.mxu1 }
 0x36b   :  { %v2431_v44 = vpop.f32.mrf.mxu3 }
 0x36c   :  { %v4078_v25 = vmul.f32 %v2954_v37, %v2950_v11  ;;  %v2360_v0 = vadd.f32 %v2359_v24, %v2319_v54  ;;  %v2432_v31 = vadd.f32 %v2431_v44, %v2396_v59  ;;  %v2938_v24 = vmul.f32 2.0, %v2930_v52 }
 0x36e   :  { %v2935_v55 = vsub.f32 %v2360_v0, %v4456_v26  ;;  %3026 = vrcp.f32 %v4078_v25  ;;  %vm2963_vm2 = vweird.f32 %v4078_v25  ;;  %v2967_v34 = vand.u32 2147483647, %v4078_v25 }
 0x36f   :  { %v2940_v18 = vadd.f32 0.0001, %v2938_v24 }
 0x370   :  { %v2953_v27 = vadd.f32 %v2935_v55, %v2933_v28  ;;  %vm2968_vm4 = vcmp.eq.f32.partialorder %v2967_v34, 8.507059e+37 }
 0x371   :  { %v2457_v49 = vpop.f32.mrf.mxu2  ;;  %v2520_v50 = vpop.f32.mrf.mxu0 }
 0x372   :  { %v2955_v17 = vadd.f32 0.0009, %v2953_v27  ;;  %v2458_v8 = vadd.f32 %v2457_v49, %v2428_v41  ;;  %v2551_v1 = vpop.f32.mrf.mxu1  ;;  %v2969_v27 = vand.u32 2147483648, %v4078_v25 }
 0x373   :  { %v2487_v9 = vpop.f32.mrf.mxu3 }
 0x374   :  { %v4085_v40 = vmul.f32 %v2955_v17, %v2951_v42  ;;  %v2488_v13 = vadd.f32 %v2487_v9, %v2458_v8  ;;  %v3027_v12 = vpop.eup %3026  ;;  %v2970_v9 = vor.u32 1.1754944e-38, %v2969_v27 }
 0x375   :  { %v2959_v2 = vmul.f32 %v3027_v12, %v4078_v25  ;;  %vm2964_vm1 = vweird.f32 %v3027_v12 }
 0x376   :  { %v2521_v7 = vadd.f32 %v2520_v50, %v2488_v13  ;;  %3028 = vrcp.f32 %v4085_v40  ;;  %vm2965_vm3 = vmor %vm2963_vm2, %vm2964_vm1  ;;  %vm2978_vm6 = vweird.f32 %v4085_v40 }
 0x377   :  { %v2960_v4 = vsub.f32 1.0, %v2959_v2 }
 0x378   :  { %v2548_v16 = vadd.f32 %v2547_v45, %v2521_v7 }
 0x379   :  { %v2462_v19 = vpop.f32.mrf.mxu2  ;;  %v2524_v47 = vpop.f32.mrf.mxu0  ;;  %v2961_v11 = vmul.f32 %v3027_v12, %v2960_v4 }
 0x37a   :  { %v2586_v43 = vand.u32 4294901760, %v2548_v16  ;;  %v2463_v32 = vadd.f32 %v2462_v19, %v2432_v31  ;;  %v4458_v31 = vld [vmem:[#allocation26_spill] sm:$0xff] }
 0x37b   :  { %v2493_v57 = vpop.f32.mrf.mxu3  ;;  %v2962_v0 = vadd.f32 %v3027_v12, %v2961_v11 }
 0x37c   :  { %v2587_v28 = vsub.f32 %v2548_v16, %v2586_v43  ;;  %v2494_v22 = vadd.f32 %v2493_v57, %v2463_v32  ;;  %2700 = vmatmul.f32.vlgmr.msrb.gmra.mxu3 %v2586_v43  ;;  %v3029_v21 = vpop.eup %3028  ;;  %v2939_v16 = vmul.f32 2.0, %v4458_v31  ;;  %v2984_v57 = vand.u32 2147483648, %v4085_v40 }
 0x37d   :  { %v2974_v5 = vmul.f32 %v3029_v21, %v4085_v40  ;;  %v2966_v49 = vsel %vm2965_vm3, %v3027_v12, %v2962_v0  ;;  %vm2979_vm5 = vweird.f32 %v3029_v21 }
 0x37e   :  { %v2588_v53 = vand.u32 4294901760, %v2587_v28  ;;  %v2525_v51 = vadd.f32 %v2524_v47, %v2494_v22  ;;  %2758 = vmatmul.f32.vlgmr.msrb.gmra.mxu0 %v2587_v28  ;;  %v2971_v19 = vsel %vm2968_vm4, %v2970_v9, %v2966_v49  ;;  %vm2980_vm7 = vmor %vm2978_vm6, %vm2979_vm5  ;;  %v2941_v22 = vadd.f32 0.0001, %v2939_v16 }
 0x37f   :  { %v2975_v26 = vsub.f32 1.0, %v2974_v5 }
 0x380   :  { %v2589_v48 = vsub.f32 %v2587_v28, %v2588_v53  ;;  %v2552_v35 = vadd.f32 %v2551_v1, %v2525_v51  ;;  %2802 = vmatmul.f32.vlgmr.msrb.gmra.mxu1 %v2588_v53  ;;  %v2982_v28 = vand.u32 2147483647, %v4085_v40  ;;  %v2985_v51 = vor.u32 1.1754944e-38, %v2984_v57 }
 0x381   :  { %v2976_v8 = vmul.f32 %v3029_v21, %v2975_v26 }
 0x382   :  { %v2590_v14 = vand.u32 4294901760, %v2589_v48  ;;  %v2594_v56 = vand.u32 4294901760, %v2552_v35  ;;  %vm2983_vm8 = vcmp.eq.f32.partialorder %v2982_v28, 8.507059e+37 }
 0x383   :  { %v2977_v25 = vadd.f32 %v3029_v21, %v2976_v8 }
 0x384   :  { %v2595_v15 = vsub.f32 %v2552_v35, %v2594_v56  ;;  %2591 = vmatmul.f32.vlgmr.msrb.gmra.mxu2 %v2590_v14  ;;  %2704 = vmatmul.f32.gmra.mxu3 %v2594_v56 }
 0x385   :  { %v2981_v53 = vsel %vm2980_vm7, %v3029_v21, %v2977_v25 }
 0x386   :  { %2763 = vmatmul.f32.gmra.mxu0 %v2595_v15  ;;  %v2596_v29 = vand.u32 4294901760, %v2595_v15  ;;  %v2986_v35 = vsel %vm2983_vm8, %v2985_v51, %v2981_v53 }
 0x388   :  { %2808 = vmatmul.f32.gmra.mxu1 %v2596_v29  ;;  %v2597_v36 = vsub.f32 %v2595_v15, %v2596_v29 }
 0x38a   :  { %v2598_v6 = vand.u32 4294901760, %v2597_v36 }
 0x38c   :  { %2599 = vmatmul.f32.gmra.mxu2 %v2598_v6  ;;  %2918 = vmatmul.f32.vlgmr.msra.gmra.mxu3 %v2586_v43 }
 0x394   :  { %2877 = vmatmul.f32.vlgmr.msra.gmra.mxu2 %v2586_v43  ;;  %2922 = vmatmul.f32.gmra.mxu3 %v2594_v56 }
 0x39c   :  { %2881 = vmatmul.f32.gmra.mxu2 %v2594_v56 }
 0x3fb   :  { %v2759_v39 = vpop.f32.mrf.mxu0 }
 0x3fd   :  { %v2803_v10 = vpop.f32.mrf.mxu1 }
 0x3ff   :  { %v2701_v23 = vpop.f32.mrf.mxu3 }
 0x403   :  { %v2764_v37 = vpop.f32.mrf.mxu0 }
 0x405   :  { %v2809_v55 = vpop.f32.mrf.mxu1 }
 0x407   :  { %v2592_v63 = vpop.f32.mrf.mxu2  ;;  %v2705_v33 = vpop.f32.mrf.mxu3 }
 0x408   :  { %v2702_v20 = vadd.f32 %v2701_v23, %v2592_v63 }
 0x40a   :  { %v2760_v3 = vadd.f32 %v2759_v39, %v2702_v20 }
 0x40c   :  { %v2804_v38 = vadd.f32 %v2803_v10, %v2760_v3 }
 0x40f   :  { %v2600_v61 = vpop.f32.mrf.mxu2  ;;  %v2919_v58 = vpop.f32.mrf.mxu3 }
 0x410   :  { %v2706_v30 = vadd.f32 %v2705_v33, %v2600_v61 }
 0x412   :  { %v2765_v54 = vadd.f32 %v2764_v37, %v2706_v30 }
 0x414   :  { %v2810_v62 = vadd.f32 %v2809_v55, %v2765_v54 }
 0x417   :  { %v2878_v60 = vpop.f32.mrf.mxu2  ;;  %v2923_v45 = vpop.f32.mrf.mxu3 }
 0x418   :  { %v2879_v46 = vadd.f32 %v2878_v60, %v2804_v38 }
 0x41a   :  { %v2920_v59 = vadd.f32 %v2919_v58, %v2879_v46 }
 0x41c   :  { %v2936_v44 = vsub.f32 %v2920_v59, %v2930_v52 }
 0x41e   :  { %v2942_v41 = vmul.f32 2.0, %v2936_v44 }
 0x41f   :  { %v2882_v42 = vpop.f32.mrf.mxu2 }
 0x420   :  { %v2944_v17 = vadd.f32 0.0009, %v2942_v41  ;;  %v2883_v50 = vadd.f32 %v2882_v42, %v2810_v62 }
 0x422   :  { %v2946_v13 = vmul.f32 %v2944_v17, %v2940_v18  ;;  %v2924_v7 = vadd.f32 %v2923_v45, %v2883_v50 }
 0x424   :  { %v2972_v43 = vmul.f32 %v2971_v19, %v2946_v13  ;;  %v2937_v32 = vsub.f32 %v2924_v7, %v4458_v31 }
 0x426   :  { %v2943_v47 = vmul.f32 2.0, %v2937_v32 }
 0x428   :  { %v2945_v1 = vadd.f32 0.0009, %v2943_v47 }
 0x42a   :  { %v2947_v48 = vmul.f32 %v2945_v1, %v2941_v22 }
 0x42c   :  { %v2987_v14 = vmul.f32 %v2986_v35, %v2947_v48 }
 0x42e   :  { %v2988_v56 = vadd.f32 %v2987_v14, %v2972_v43 }
 0x430   :  { %v2989_v15 = vrot.slane %v2988_v56, 4 }
 0x432   :  { %v2990_v29 = vadd.f32 %v2989_v15, %v2988_v56 }
 0x434   :  { %v2991_v36 = vrot.slane %v2990_v29, 2 }
 0x436   :  { %v2992_v6 = vadd.f32 %v2991_v36, %v2990_v29 }
 0x438   :  { %v2993_v40 = vrot.slane %v2992_v6, 1 }
 0x43a   :  { %v2994_v23 = vadd.f32 %v2993_v40, %v2992_v6 }
 0x43c   :  { %2995 = vst [vmem:[#allocation10] sm:$0x1] %v2994_v23 }
 0x43d   :  { %3006 = dma.vmem_to_hbm [thread:$0]  %s3002_s3, 16, %s3004_s11, [#allocation4]  }
 0x43e   :  { %3160 = dma.done.wait [#allocation4], 16  }
 0x43f   :  { %3161 = vsyncadd [#allocation4], 4294967280 }
 0x440   :  { %3011 = vsyncpa [#allocation3], 1 }
 0x441   :  { %3012 = vsyncpa [#allocation6], 1 }
 0x442   :  { %3013 = vsyncpa [#allocation9], 1 }
 0x443   :  { %3014 = vsyncpa [#allocation4], 1 }

</bundles_post_ra>
